<compile_context>
chip_gen: v7x
topology: tpu7x:2x2x1
jax: 0.10.0
libtpu: 0.0.40
codegen_flags: <defaults>
</compile_context>

<pallas_src>
import numpy as np

import jax
import jax.numpy as jnp
from jax import lax
from jax.experimental import pallas as pl
from jax.experimental.pallas import tpu as pltpu


def _round_up(v, m):
    return (v + m - 1) // m * m


def _choose_bn(n):
    """Batch-tile size: multiple of 16 (full bf16 vregs), capped at 64 (VMEM),
    and small enough to keep >=2 grid steps (v7x megacore) when the batch allows."""
    return min(64, max(16, _round_up((n + 1) // 2, 16)))


# ----------------------------------------------------------------------------
# Host-side constant builders (pure layout of the small weights / input).
# ----------------------------------------------------------------------------
def _build_conv1_lhs(x, bn, n_blocks):
    """x: (N,1,28,28) f32 -> (n_blocks*28*bn, 90) bf16 banded conv1 LHS.

    Rows ordered (g, pu, u', nl); cols (kh, w) where w indexes the zero-padded
    30-wide input row.  Row (g,pu,u',nl), col-block kh holds padded input row
    2*u'+pu+kh of sample g*bn+nl (pu = pool row tap)."""
    n = x.shape[0]
    n_pad = n_blocks * bn
    xp = jnp.pad(x[:, 0], ((0, n_pad - n), (1, 1), (1, 1)))          # (n_pad, 30, 30)
    taps = []
    for pu in range(2):
        for kh in range(3):
            taps.append(xp[:, pu + kh:pu + kh + 27:2, :])            # (n_pad, 14, 30)
    t = jnp.stack(taps, axis=0).reshape(2, 3, n_pad, 14, 30)
    t = t.transpose(2, 0, 3, 1, 4)                                   # (n, pu, u', kh, w)
    t = t.reshape(n_blocks, bn, 2, 14, 3, 30).transpose(0, 2, 3, 1, 4, 5)
    return t.reshape(n_blocks * 28 * bn, 90).astype(jnp.bfloat16)


def _build_conv1_rhs(w1):
    """w1: (8,1,3,3) -> banded (90, 256).

    Rows (kh, w in [0,30)); cols (pw, w', co) with each pw (pool col tap) block
    zero-padded from 112 to 128 lanes.  Nonzero iff w == 2*w' + pw + kw."""
    blocks_kh = []
    for kh in range(3):
        pw_blocks = []
        for pw in range(2):
            blk = jnp.zeros((30, 112), jnp.float32)
            for kw in range(3):
                sel = np.zeros((30, 14), np.float32)
                sel[np.arange(14) * 2 + pw + kw, np.arange(14)] = 1.0
                blk = blk + jnp.kron(jnp.asarray(sel), w1[:, 0, kh, kw][None, :])
            pw_blocks.append(jnp.pad(blk, ((0, 0), (0, 16))))        # (30, 128)
        blocks_kh.append(jnp.concatenate(pw_blocks, axis=1))         # (30, 256)
    return jnp.concatenate(blocks_kh, axis=0).astype(jnp.bfloat16)   # (90, 256)


def _build_conv2_rhs(w2):
    """w2: (16,8,3,3) -> banded (3, 128, 256), one 128-row band per kh.

    Band rows (w' in [0,16), c) match the conv1 activation lanes (w' >= 14 are
    zero-pad lanes and drop out); cols (pw2, j, co) with each pw2 block padded
    to 128 lanes.  Nonzero iff w' == 2*j + pw2 + kw - 1."""
    bands = []
    for kh in range(3):
        pw_blocks = []
        for pw2 in range(2):
            blk = jnp.zeros((128, 112), jnp.float32)
            for kw in range(3):
                sel = np.zeros((16, 7), np.float32)
                for j in range(7):
                    wp = 2 * j + pw2 + kw - 1
                    if 0 <= wp < 14:
                        sel[wp, j] = 1.0
                blk = blk + jnp.kron(jnp.asarray(sel), w2[:, :, kh, kw].T)
            pw_blocks.append(jnp.pad(blk, ((0, 0), (0, 16))))        # (128, 128)
        bands.append(jnp.concatenate(pw_blocks, axis=1))             # (128, 256)
    return jnp.stack(bands, axis=0).astype(jnp.bfloat16)             # (3, 128, 256)


def _build_fc_rhs(wfc):
    """wfc: (10, 784) with PyTorch flatten order (co, i, j) -> (7, 128, 128).

    Slab i's rows match the kernel's y2 lanes (lane = j*16+co, top 16 lanes
    zero); cols are the 10 classes padded to 128."""
    w = wfc.reshape(10, 16, 7, 7)            # (k, co, i, j)
    w = w.transpose(2, 3, 1, 0)              # (i, j, co, k)
    w = w.reshape(7, 112, 10)
    w = jnp.pad(w, ((0, 0), (0, 16), (0, 118)))                      # (7, 128, 128)
    return w.astype(jnp.bfloat16)


# ----------------------------------------------------------------------------
# The fused Pallas kernel (one grid step = bn samples).
# ----------------------------------------------------------------------------
def _make_kernel(bn):
    def kernel(x1_ref, w1_ref, b1_ref, w2_ref, b2_ref, wfc_ref, bfc_ref,
               o_ref, l2k0_ref, l2k1_ref, l2k2_ref):
        l2 = (l2k0_ref, l2k1_ref, l2k2_ref)

        # ---- conv1 (3x3, pad 1) + 2x2 max-pool + ReLU : ONE bf16 MXU dot ----
        z1 = jnp.dot(x1_ref[...], w1_ref[...],
                     preferred_element_type=jnp.float32)             # (28*bn, 256)
        z1 = jnp.maximum(z1[:14 * bn, :], z1[14 * bn:, :])           # pool row tap (pu)
        z1 = jnp.maximum(z1[:, :128], z1[:, 128:])                   # pool col tap (pw)
        y1 = jnp.maximum(z1 + b1_ref[...], 0.0)                      # bias hoisted past max
        y1 = y1.astype(jnp.bfloat16)                                 # (14*bn, 128)

        # ---- conv2 staging: scatter y1 row-blocks into 3 per-kh banded LHS ----
        # Full-vreg (bn,128) stores; only the 2 never-written blocks get zeros.
        for kh in range(3):
            dst = l2[kh]
            for pu2 in range(2):
                for i in range(7):
                    u = 2 * i + pu2 + kh - 1                         # y1 row; OOB == zero pad
                    r0 = (pu2 * 7 + i) * bn
                    if 0 <= u < 14:
                        dst[r0:r0 + bn, :] = y1[u * bn:(u + 1) * bn, :]
                    else:
                        dst[r0:r0 + bn, :] = jnp.zeros((bn, 128), jnp.bfloat16)

        # ---- conv2 (3x3, pad 1) + 2x2 max-pool + ReLU : 3 accumulated dots ----
        z2 = jnp.dot(l2[0][...], w2_ref[0], preferred_element_type=jnp.float32)
        z2 = z2 + jnp.dot(l2[1][...], w2_ref[1], preferred_element_type=jnp.float32)
        z2 = z2 + jnp.dot(l2[2][...], w2_ref[2], preferred_element_type=jnp.float32)
        z2 = jnp.maximum(z2[:7 * bn, :], z2[7 * bn:, :])             # pool row tap (pu2)
        z2 = jnp.maximum(z2[:, :128], z2[:, 128:])                   # pool col tap (pw2)
        y2 = jnp.maximum(z2 + b2_ref[...], 0.0)                      # (7*bn, 128)
        y2 = y2.astype(jnp.bfloat16)

        # ---- fc + log_softmax : 7 accumulated dots straight from y2 ----
        # (classes padded to 128 lanes; pad lanes carry a -1e30 bias, kept in f32)
        logits = jnp.zeros((bn, 128), jnp.float32) + bfc_ref[...]
        for i in range(7):
            logits = logits + jnp.dot(y2[i * bn:(i + 1) * bn, :], wfc_ref[i],
                                      preferred_element_type=jnp.float32)
        m = jnp.max(logits, axis=-1, keepdims=True)
        e = jnp.exp(logits - m)
        o_ref[...] = logits - m - jnp.log(jnp.sum(e, axis=-1, keepdims=True))

    return kernel


# ----------------------------------------------------------------------------
# Full forward pass (matches SmallConvNet.forward)
# ----------------------------------------------------------------------------
def smallconvnet_forward(x, params):
    w1, b1, w2, b2, wfc, bfc = params
    n = x.shape[0]
    bn = _choose_bn(n)
    n_blocks = (n + bn - 1) // bn
    n_pad = n_blocks * bn

    x1 = _build_conv1_lhs(x, bn, n_blocks)          # (n_blocks*28*bn, 90)  bf16
    w1b = _build_conv1_rhs(w1)                      # (90, 256)             bf16
    w2b = _build_conv2_rhs(w2)                      # (3, 128, 256)         bf16
    wfb = _build_fc_rhs(wfc)                        # (7, 128, 128)         bf16
    b1p = jnp.pad(jnp.tile(b1, 14), (0, 16)).reshape(1, 128)             # f32
    b2p = jnp.pad(jnp.tile(b2, 7), (0, 16)).reshape(1, 128)              # f32
    bfcp = jnp.concatenate(
        [bfc, jnp.full((118,), -1e30, jnp.float32)]).reshape(1, 128)     # f32

    out = pl.pallas_call(
        _make_kernel(bn),
        out_shape=jax.ShapeDtypeStruct((n_pad, 128), jnp.float32),
        grid_spec=pltpu.PrefetchScalarGridSpec(
            num_scalar_prefetch=0,
            grid=(n_blocks,),
            in_specs=[
                pl.BlockSpec((28 * bn, 90), lambda g: (g, 0)),       # conv1 LHS (per batch tile)
                pl.BlockSpec((90, 256), lambda g: (0, 0)),           # banded conv1 weights
                pl.BlockSpec((1, 128), lambda g: (0, 0)),            # conv1 bias (tiled, padded)
                pl.BlockSpec((3, 128, 256), lambda g: (0, 0, 0)),    # banded conv2 weights (per kh)
                pl.BlockSpec((1, 128), lambda g: (0, 0)),            # conv2 bias (tiled, padded)
                pl.BlockSpec((7, 128, 128), lambda g: (0, 0, 0)),    # fc weights (permuted, padded)
                pl.BlockSpec((1, 128), lambda g: (0, 0)),            # fc bias (padded with -1e30)
            ],
            out_specs=pl.BlockSpec((bn, 128), lambda g: (g, 0)),
            scratch_shapes=[
                pltpu.VMEM((14 * bn, 128), jnp.bfloat16),            # conv2 LHS band kh=0
                pltpu.VMEM((14 * bn, 128), jnp.bfloat16),            # conv2 LHS band kh=1
                pltpu.VMEM((14 * bn, 128), jnp.bfloat16),            # conv2 LHS band kh=2
            ],
        ),
        compiler_params=pltpu.CompilerParams(
            dimension_semantics=("parallel",),       # v7x: split batch tiles across the 2 TCs
            vmem_limit_bytes=32 * 1024 * 1024,
        ),
    )(x1, w1b, b1p, w2b, b2p, wfb, bfcp)

    return out[:n, :10]


# ----------------------------------------------------------------------------
# Pure-JAX f32 reference for verification
# ----------------------------------------------------------------------------
def reference_forward(x, params):
    w1, b1, w2, b2, wfc, bfc = params
    dn = ("NCHW", "OIHW", "NCHW")

    y = lax.conv_general_dilated(x, w1, (1, 1), ((1, 1), (1, 1)), dimension_numbers=dn)
    y = y + b1[None, :, None, None]
    y = lax.reduce_window(y, -jnp.inf, lax.max, (1, 1, 2, 2), (1, 1, 2, 2), "VALID")
    y = jnp.maximum(y, 0.0)

    y = lax.conv_general_dilated(y, w2, (1, 1), ((1, 1), (1, 1)), dimension_numbers=dn)
    y = y + b2[None, :, None, None]
    y = lax.reduce_window(y, -jnp.inf, lax.max, (1, 1, 2, 2), (1, 1, 2, 2), "VALID")
    y = jnp.maximum(y, 0.0)

    y = y.reshape(x.shape[0], 7 * 7 * 16)
    logits = y @ wfc.T + bfc
    return jax.nn.log_softmax(logits, axis=1)


# ----------------------------------------------------------------------------
# Main
# ----------------------------------------------------------------------------
if __name__ == "__main__":
    key = jax.random.PRNGKey(0)
    k = jax.random.split(key, 8)

    # Deterministic synthetic parameters (same shapes as the PyTorch module).
    w1 = 0.1 * jax.random.normal(k[0], (8, 1, 3, 3), jnp.float32)
    b1 = 0.1 * jax.random.normal(k[1], (8,), jnp.float32)
    w2 = 0.1 * jax.random.normal(k[2], (16, 8, 3, 3), jnp.float32)
    b2 = 0.1 * jax.random.normal(k[3], (16,), jnp.float32)
    wfc = 0.05 * jax.random.normal(k[4], (10, 7 * 7 * 16), jnp.float32)
    bfc = 0.05 * jax.random.normal(k[5], (10,), jnp.float32)
    params = (w1, b1, w2, b2, wfc, bfc)

    fwd = jax.jit(smallconvnet_forward)

    # MNIST-shaped input (the fc layer requires 28x28 spatial); small batch.
    x = jax.random.normal(k[6], (2, 1, 28, 28), jnp.float32)
    out = jax.block_until_ready(fwd(x, params))
    ref = jax.block_until_ready(reference_forward(x, params))
    assert out.shape == (2, 10)
    # bf16 MXU operands with f32 accumulation -> loosened tolerance.
    assert jnp.allclose(out, ref, atol=2e-2, rtol=2e-2), (
        f"max abs err {jnp.max(jnp.abs(out - ref))}")

    # Second check exercising the multi-block ("parallel") grid + ragged tail.
    x2 = jax.random.normal(k[7], (18, 1, 28, 28), jnp.float32)
    out2 = jax.block_until_ready(fwd(x2, params))
    ref2 = jax.block_until_ready(reference_forward(x2, params))
    assert out2.shape == (18, 10)
    assert jnp.allclose(out2, ref2, atol=2e-2, rtol=2e-2), (
        f"max abs err {jnp.max(jnp.abs(out2 - ref2))}")

    print("KERNEL_OK")
</pallas_src>

<mosaic_0001>
module attributes {stable_mosaic.version = 11 : i64} {
  func.func @kernel(%arg0: i32, %arg1: memref<448x90xbf16, #tpu.memory_space<vmem>>, %arg2: memref<90x256xbf16, #tpu.memory_space<vmem>>, %arg3: memref<1x128xf32, #tpu.memory_space<vmem>>, %arg4: memref<3x128x256xbf16, #tpu.memory_space<vmem>>, %arg5: memref<1x128xf32, #tpu.memory_space<vmem>>, %arg6: memref<7x128x128xbf16, #tpu.memory_space<vmem>>, %arg7: memref<1x128xf32, #tpu.memory_space<vmem>>, %arg8: memref<16x128xf32, #tpu.memory_space<vmem>>, %arg9: memref<224x128xbf16, #tpu.memory_space<vmem>>, %arg10: memref<224x128xbf16, #tpu.memory_space<vmem>>, %arg11: memref<224x128xbf16, #tpu.memory_space<vmem>>) attributes {dimension_semantics = [#tpu.dimension_semantics<parallel>], iteration_bounds = array<i64: 1>, scalar_prefetch = 0 : i64, scratch_operands = 3 : i64, tpu.core_type = #tpu.core_type<tc>, window_params = [{transform_indices = @transform_0, window_bounds = array<i64: 448, 90>}, {pipeline_mode = #tpu.pipeline_mode<synchronous>, transform_indices = @transform_1, window_bounds = array<i64: 90, 256>}, {pipeline_mode = #tpu.pipeline_mode<synchronous>, transform_indices = @transform_2, window_bounds = array<i64: 1, 128>}, {pipeline_mode = #tpu.pipeline_mode<synchronous>, transform_indices = @transform_3, window_bounds = array<i64: 3, 128, 256>}, {pipeline_mode = #tpu.pipeline_mode<synchronous>, transform_indices = @transform_4, window_bounds = array<i64: 1, 128>}, {pipeline_mode = #tpu.pipeline_mode<synchronous>, transform_indices = @transform_5, window_bounds = array<i64: 7, 128, 128>}, {pipeline_mode = #tpu.pipeline_mode<synchronous>, transform_indices = @transform_6, window_bounds = array<i64: 1, 128>}, {transform_indices = @transform_7, window_bounds = array<i64: 16, 128>}]} {
    %c0 = arith.constant 0 : index
    %c0_0 = arith.constant 0 : index
    %0 = vector.load %arg1[%c0, %c0_0] : memref<448x90xbf16, #tpu.memory_space<vmem>>, vector<448x90xbf16>
    %c0_1 = arith.constant 0 : index
    %c0_2 = arith.constant 0 : index
    %1 = vector.load %arg2[%c0_1, %c0_2] : memref<90x256xbf16, #tpu.memory_space<vmem>>, vector<90x256xbf16>
    %cst = arith.constant dense<0.000000e+00> : vector<448x256xf32>
    %2 = tpu.matmul %0, %1, %cst {dimension_numbers = #tpu.dot_dimension_numbers<[1], [0], [0], [1], [0, 0, 1, 1], [], []>} : vector<448x90xbf16>, vector<90x256xbf16>, vector<448x256xf32> -> vector<448x256xf32>
    %3 = vector.extract_strided_slice %2 {offsets = [0, 0], sizes = [224, 256], strides = [1, 1]} : vector<448x256xf32> to vector<224x256xf32>
    %4 = vector.extract_strided_slice %2 {offsets = [224, 0], sizes = [224, 256], strides = [1, 1]} : vector<448x256xf32> to vector<224x256xf32>
    %5 = arith.maximumf %3, %4 : vector<224x256xf32>
    %6 = vector.extract_strided_slice %5 {offsets = [0, 0], sizes = [224, 128], strides = [1, 1]} : vector<224x256xf32> to vector<224x128xf32>
    %7 = vector.extract_strided_slice %5 {offsets = [0, 128], sizes = [224, 128], strides = [1, 1]} : vector<224x256xf32> to vector<224x128xf32>
    %8 = arith.maximumf %6, %7 : vector<224x128xf32>
    %c0_3 = arith.constant 0 : index
    %c0_4 = arith.constant 0 : index
    %9 = vector.load %arg3[%c0_3, %c0_4] : memref<1x128xf32, #tpu.memory_space<vmem>>, vector<1x128xf32>
    %10 = vector.broadcast %9 : vector<1x128xf32> to vector<224x128xf32>
    %11 = arith.addf %8, %10 : vector<224x128xf32>
    %cst_5 = arith.constant 0.000000e+00 : f32
    %12 = vector.broadcast %cst_5 : f32 to vector<224x128xf32>
    %13 = arith.maximumf %11, %12 : vector<224x128xf32>
    %14 = arith.truncf %13 : vector<224x128xf32> to vector<224x128xbf16>
    %cst_6 = arith.constant 0.000000e+00 : bf16
    %15 = vector.broadcast %cst_6 : bf16 to vector<16x128xbf16>
    %c0_7 = arith.constant 0 : index
    %c0_8 = arith.constant 0 : index
    %16 = vector.load %arg9[%c0_7, %c0_8] : memref<224x128xbf16, #tpu.memory_space<vmem>>, vector<16x128xbf16>
    tpu.vector_store %arg9[%c0_7, %c0_8], %15 {strides = array<i32>} : memref<224x128xbf16, #tpu.memory_space<vmem>>, vector<16x128xbf16>,
    %17 = vector.extract_strided_slice %14 {offsets = [16, 0], sizes = [16, 128], strides = [1, 1]} : vector<224x128xbf16> to vector<16x128xbf16>
    %c16 = arith.constant 16 : index
    %c0_9 = arith.constant 0 : index
    %18 = vector.load %arg9[%c16, %c0_9] : memref<224x128xbf16, #tpu.memory_space<vmem>>, vector<16x128xbf16>
    tpu.vector_store %arg9[%c16, %c0_9], %17 {strides = array<i32>} : memref<224x128xbf16, #tpu.memory_space<vmem>>, vector<16x128xbf16>,
    %19 = vector.extract_strided_slice %14 {offsets = [48, 0], sizes = [16, 128], strides = [1, 1]} : vector<224x128xbf16> to vector<16x128xbf16>
    %c32 = arith.constant 32 : index
    %c0_10 = arith.constant 0 : index
    %20 = vector.load %arg9[%c32, %c0_10] : memref<224x128xbf16, #tpu.memory_space<vmem>>, vector<16x128xbf16>
    tpu.vector_store %arg9[%c32, %c0_10], %19 {strides = array<i32>} : memref<224x128xbf16, #tpu.memory_space<vmem>>, vector<16x128xbf16>,
    %21 = vector.extract_strided_slice %14 {offsets = [80, 0], sizes = [16, 128], strides = [1, 1]} : vector<224x128xbf16> to vector<16x128xbf16>
    %c48 = arith.constant 48 : index
    %c0_11 = arith.constant 0 : index
    %22 = vector.load %arg9[%c48, %c0_11] : memref<224x128xbf16, #tpu.memory_space<vmem>>, vector<16x128xbf16>
    tpu.vector_store %arg9[%c48, %c0_11], %21 {strides = array<i32>} : memref<224x128xbf16, #tpu.memory_space<vmem>>, vector<16x128xbf16>,
    %23 = vector.extract_strided_slice %14 {offsets = [112, 0], sizes = [16, 128], strides = [1, 1]} : vector<224x128xbf16> to vector<16x128xbf16>
    %c64 = arith.constant 64 : index
    %c0_12 = arith.constant 0 : index
    %24 = vector.load %arg9[%c64, %c0_12] : memref<224x128xbf16, #tpu.memory_space<vmem>>, vector<16x128xbf16>
    tpu.vector_store %arg9[%c64, %c0_12], %23 {strides = array<i32>} : memref<224x128xbf16, #tpu.memory_space<vmem>>, vector<16x128xbf16>,
    %25 = vector.extract_strided_slice %14 {offsets = [144, 0], sizes = [16, 128], strides = [1, 1]} : vector<224x128xbf16> to vector<16x128xbf16>
    %c80 = arith.constant 80 : index
    %c0_13 = arith.constant 0 : index
    %26 = vector.load %arg9[%c80, %c0_13] : memref<224x128xbf16, #tpu.memory_space<vmem>>, vector<16x128xbf16>
    tpu.vector_store %arg9[%c80, %c0_13], %25 {strides = array<i32>} : memref<224x128xbf16, #tpu.memory_space<vmem>>, vector<16x128xbf16>,
    %27 = vector.extract_strided_slice %14 {offsets = [176, 0], sizes = [16, 128], strides = [1, 1]} : vector<224x128xbf16> to vector<16x128xbf16>
    %c96 = arith.constant 96 : index
    %c0_14 = arith.constant 0 : index
    %28 = vector.load %arg9[%c96, %c0_14] : memref<224x128xbf16, #tpu.memory_space<vmem>>, vector<16x128xbf16>
    tpu.vector_store %arg9[%c96, %c0_14], %27 {strides = array<i32>} : memref<224x128xbf16, #tpu.memory_space<vmem>>, vector<16x128xbf16>,
    %29 = vector.extract_strided_slice %14 {offsets = [0, 0], sizes = [16, 128], strides = [1, 1]} : vector<224x128xbf16> to vector<16x128xbf16>
    %c112 = arith.constant 112 : index
    %c0_15 = arith.constant 0 : index
    %30 = vector.load %arg9[%c112, %c0_15] : memref<224x128xbf16, #tpu.memory_space<vmem>>, vector<16x128xbf16>
    tpu.vector_store %arg9[%c112, %c0_15], %29 {strides = array<i32>} : memref<224x128xbf16, #tpu.memory_space<vmem>>, vector<16x128xbf16>,
    %31 = vector.extract_strided_slice %14 {offsets = [32, 0], sizes = [16, 128], strides = [1, 1]} : vector<224x128xbf16> to vector<16x128xbf16>
    %c128 = arith.constant 128 : index
    %c0_16 = arith.constant 0 : index
    %32 = vector.load %arg9[%c128, %c0_16] : memref<224x128xbf16, #tpu.memory_space<vmem>>, vector<16x128xbf16>
    tpu.vector_store %arg9[%c128, %c0_16], %31 {strides = array<i32>} : memref<224x128xbf16, #tpu.memory_space<vmem>>, vector<16x128xbf16>,
    %33 = vector.extract_strided_slice %14 {offsets = [64, 0], sizes = [16, 128], strides = [1, 1]} : vector<224x128xbf16> to vector<16x128xbf16>
    %c144 = arith.constant 144 : index
    %c0_17 = arith.constant 0 : index
    %34 = vector.load %arg9[%c144, %c0_17] : memref<224x128xbf16, #tpu.memory_space<vmem>>, vector<16x128xbf16>
    tpu.vector_store %arg9[%c144, %c0_17], %33 {strides = array<i32>} : memref<224x128xbf16, #tpu.memory_space<vmem>>, vector<16x128xbf16>,
    %35 = vector.extract_strided_slice %14 {offsets = [96, 0], sizes = [16, 128], strides = [1, 1]} : vector<224x128xbf16> to vector<16x128xbf16>
    %c160 = arith.constant 160 : index
    %c0_18 = arith.constant 0 : index
    %36 = vector.load %arg9[%c160, %c0_18] : memref<224x128xbf16, #tpu.memory_space<vmem>>, vector<16x128xbf16>
    tpu.vector_store %arg9[%c160, %c0_18], %35 {strides = array<i32>} : memref<224x128xbf16, #tpu.memory_space<vmem>>, vector<16x128xbf16>,
    %37 = vector.extract_strided_slice %14 {offsets = [128, 0], sizes = [16, 128], strides = [1, 1]} : vector<224x128xbf16> to vector<16x128xbf16>
    %c176 = arith.constant 176 : index
    %c0_19 = arith.constant 0 : index
    %38 = vector.load %arg9[%c176, %c0_19] : memref<224x128xbf16, #tpu.memory_space<vmem>>, vector<16x128xbf16>
    tpu.vector_store %arg9[%c176, %c0_19], %37 {strides = array<i32>} : memref<224x128xbf16, #tpu.memory_space<vmem>>, vector<16x128xbf16>,
    %39 = vector.extract_strided_slice %14 {offsets = [160, 0], sizes = [16, 128], strides = [1, 1]} : vector<224x128xbf16> to vector<16x128xbf16>
    %c192 = arith.constant 192 : index
    %c0_20 = arith.constant 0 : index
    %40 = vector.load %arg9[%c192, %c0_20] : memref<224x128xbf16, #tpu.memory_space<vmem>>, vector<16x128xbf16>
    tpu.vector_store %arg9[%c192, %c0_20], %39 {strides = array<i32>} : memref<224x128xbf16, #tpu.memory_space<vmem>>, vector<16x128xbf16>,
    %41 = vector.extract_strided_slice %14 {offsets = [192, 0], sizes = [16, 128], strides = [1, 1]} : vector<224x128xbf16> to vector<16x128xbf16>
    %c208 = arith.constant 208 : index
    %c0_21 = arith.constant 0 : index
    %42 = vector.load %arg9[%c208, %c0_21] : memref<224x128xbf16, #tpu.memory_space<vmem>>, vector<16x128xbf16>
    tpu.vector_store %arg9[%c208, %c0_21], %41 {strides = array<i32>} : memref<224x128xbf16, #tpu.memory_space<vmem>>, vector<16x128xbf16>,
    %43 = vector.extract_strided_slice %14 {offsets = [0, 0], sizes = [16, 128], strides = [1, 1]} : vector<224x128xbf16> to vector<16x128xbf16>
    %c0_22 = arith.constant 0 : index
    %c0_23 = arith.constant 0 : index
    %44 = vector.load %arg10[%c0_22, %c0_23] : memref<224x128xbf16, #tpu.memory_space<vmem>>, vector<16x128xbf16>
    tpu.vector_store %arg10[%c0_22, %c0_23], %43 {strides = array<i32>} : memref<224x128xbf16, #tpu.memory_space<vmem>>, vector<16x128xbf16>,
    %45 = vector.extract_strided_slice %14 {offsets = [32, 0], sizes = [16, 128], strides = [1, 1]} : vector<224x128xbf16> to vector<16x128xbf16>
    %c16_24 = arith.constant 16 : index
    %c0_25 = arith.constant 0 : index
    %46 = vector.load %arg10[%c16_24, %c0_25] : memref<224x128xbf16, #tpu.memory_space<vmem>>, vector<16x128xbf16>
    tpu.vector_store %arg10[%c16_24, %c0_25], %45 {strides = array<i32>} : memref<224x128xbf16, #tpu.memory_space<vmem>>, vector<16x128xbf16>,
    %47 = vector.extract_strided_slice %14 {offsets = [64, 0], sizes = [16, 128], strides = [1, 1]} : vector<224x128xbf16> to vector<16x128xbf16>
    %c32_26 = arith.constant 32 : index
    %c0_27 = arith.constant 0 : index
    %48 = vector.load %arg10[%c32_26, %c0_27] : memref<224x128xbf16, #tpu.memory_space<vmem>>, vector<16x128xbf16>
    tpu.vector_store %arg10[%c32_26, %c0_27], %47 {strides = array<i32>} : memref<224x128xbf16, #tpu.memory_space<vmem>>, vector<16x128xbf16>,
    %49 = vector.extract_strided_slice %14 {offsets = [96, 0], sizes = [16, 128], strides = [1, 1]} : vector<224x128xbf16> to vector<16x128xbf16>
    %c48_28 = arith.constant 48 : index
    %c0_29 = arith.constant 0 : index
    %50 = vector.load %arg10[%c48_28, %c0_29] : memref<224x128xbf16, #tpu.memory_space<vmem>>, vector<16x128xbf16>
    tpu.vector_store %arg10[%c48_28, %c0_29], %49 {strides = array<i32>} : memref<224x128xbf16, #tpu.memory_space<vmem>>, vector<16x128xbf16>,
    %51 = vector.extract_strided_slice %14 {offsets = [128, 0], sizes = [16, 128], strides = [1, 1]} : vector<224x128xbf16> to vector<16x128xbf16>
    %c64_30 = arith.constant 64 : index
    %c0_31 = arith.constant 0 : index
    %52 = vector.load %arg10[%c64_30, %c0_31] : memref<224x128xbf16, #tpu.memory_space<vmem>>, vector<16x128xbf16>
    tpu.vector_store %arg10[%c64_30, %c0_31], %51 {strides = array<i32>} : memref<224x128xbf16, #tpu.memory_space<vmem>>, vector<16x128xbf16>,
    %53 = vector.extract_strided_slice %14 {offsets = [160, 0], sizes = [16, 128], strides = [1, 1]} : vector<224x128xbf16> to vector<16x128xbf16>
    %c80_32 = arith.constant 80 : index
    %c0_33 = arith.constant 0 : index
    %54 = vector.load %arg10[%c80_32, %c0_33] : memref<224x128xbf16, #tpu.memory_space<vmem>>, vector<16x128xbf16>
    tpu.vector_store %arg10[%c80_32, %c0_33], %53 {strides = array<i32>} : memref<224x128xbf16, #tpu.memory_space<vmem>>, vector<16x128xbf16>,
    %55 = vector.extract_strided_slice %14 {offsets = [192, 0], sizes = [16, 128], strides = [1, 1]} : vector<224x128xbf16> to vector<16x128xbf16>
    %c96_34 = arith.constant 96 : index
    %c0_35 = arith.constant 0 : index
    %56 = vector.load %arg10[%c96_34, %c0_35] : memref<224x128xbf16, #tpu.memory_space<vmem>>, vector<16x128xbf16>
    tpu.vector_store %arg10[%c96_34, %c0_35], %55 {strides = array<i32>} : memref<224x128xbf16, #tpu.memory_space<vmem>>, vector<16x128xbf16>,
    %57 = vector.extract_strided_slice %14 {offsets = [16, 0], sizes = [16, 128], strides = [1, 1]} : vector<224x128xbf16> to vector<16x128xbf16>
    %c112_36 = arith.constant 112 : index
    %c0_37 = arith.constant 0 : index
    %58 = vector.load %arg10[%c112_36, %c0_37] : memref<224x128xbf16, #tpu.memory_space<vmem>>, vector<16x128xbf16>
    tpu.vector_store %arg10[%c112_36, %c0_37], %57 {strides = array<i32>} : memref<224x128xbf16, #tpu.memory_space<vmem>>, vector<16x128xbf16>,
    %59 = vector.extract_strided_slice %14 {offsets = [48, 0], sizes = [16, 128], strides = [1, 1]} : vector<224x128xbf16> to vector<16x128xbf16>
    %c128_38 = arith.constant 128 : index
    %c0_39 = arith.constant 0 : index
    %60 = vector.load %arg10[%c128_38, %c0_39] : memref<224x128xbf16, #tpu.memory_space<vmem>>, vector<16x128xbf16>
    tpu.vector_store %arg10[%c128_38, %c0_39], %59 {strides = array<i32>} : memref<224x128xbf16, #tpu.memory_space<vmem>>, vector<16x128xbf16>,
    %61 = vector.extract_strided_slice %14 {offsets = [80, 0], sizes = [16, 128], strides = [1, 1]} : vector<224x128xbf16> to vector<16x128xbf16>
    %c144_40 = arith.constant 144 : index
    %c0_41 = arith.constant 0 : index
    %62 = vector.load %arg10[%c144_40, %c0_41] : memref<224x128xbf16, #tpu.memory_space<vmem>>, vector<16x128xbf16>
    tpu.vector_store %arg10[%c144_40, %c0_41], %61 {strides = array<i32>} : memref<224x128xbf16, #tpu.memory_space<vmem>>, vector<16x128xbf16>,
    %63 = vector.extract_strided_slice %14 {offsets = [112, 0], sizes = [16, 128], strides = [1, 1]} : vector<224x128xbf16> to vector<16x128xbf16>
    %c160_42 = arith.constant 160 : index
    %c0_43 = arith.constant 0 : index
    %64 = vector.load %arg10[%c160_42, %c0_43] : memref<224x128xbf16, #tpu.memory_space<vmem>>, vector<16x128xbf16>
    tpu.vector_store %arg10[%c160_42, %c0_43], %63 {strides = array<i32>} : memref<224x128xbf16, #tpu.memory_space<vmem>>, vector<16x128xbf16>,
    %65 = vector.extract_strided_slice %14 {offsets = [144, 0], sizes = [16, 128], strides = [1, 1]} : vector<224x128xbf16> to vector<16x128xbf16>
    %c176_44 = arith.constant 176 : index
    %c0_45 = arith.constant 0 : index
    %66 = vector.load %arg10[%c176_44, %c0_45] : memref<224x128xbf16, #tpu.memory_space<vmem>>, vector<16x128xbf16>
    tpu.vector_store %arg10[%c176_44, %c0_45], %65 {strides = array<i32>} : memref<224x128xbf16, #tpu.memory_space<vmem>>, vector<16x128xbf16>,
    %67 = vector.extract_strided_slice %14 {offsets = [176, 0], sizes = [16, 128], strides = [1, 1]} : vector<224x128xbf16> to vector<16x128xbf16>
    %c192_46 = arith.constant 192 : index
    %c0_47 = arith.constant 0 : index
    %68 = vector.load %arg10[%c192_46, %c0_47] : memref<224x128xbf16, #tpu.memory_space<vmem>>, vector<16x128xbf16>
    tpu.vector_store %arg10[%c192_46, %c0_47], %67 {strides = array<i32>} : memref<224x128xbf16, #tpu.memory_space<vmem>>, vector<16x128xbf16>,
    %69 = vector.extract_strided_slice %14 {offsets = [208, 0], sizes = [16, 128], strides = [1, 1]} : vector<224x128xbf16> to vector<16x128xbf16>
    %c208_48 = arith.constant 208 : index
    %c0_49 = arith.constant 0 : index
    %70 = vector.load %arg10[%c208_48, %c0_49] : memref<224x128xbf16, #tpu.memory_space<vmem>>, vector<16x128xbf16>
    tpu.vector_store %arg10[%c208_48, %c0_49], %69 {strides = array<i32>} : memref<224x128xbf16, #tpu.memory_space<vmem>>, vector<16x128xbf16>,
    %71 = vector.extract_strided_slice %14 {offsets = [16, 0], sizes = [16, 128], strides = [1, 1]} : vector<224x128xbf16> to vector<16x128xbf16>
    %c0_50 = arith.constant 0 : index
    %c0_51 = arith.constant 0 : index
    %72 = vector.load %arg11[%c0_50, %c0_51] : memref<224x128xbf16, #tpu.memory_space<vmem>>, vector<16x128xbf16>
    tpu.vector_store %arg11[%c0_50, %c0_51], %71 {strides = array<i32>} : memref<224x128xbf16, #tpu.memory_space<vmem>>, vector<16x128xbf16>,
    %73 = vector.extract_strided_slice %14 {offsets = [48, 0], sizes = [16, 128], strides = [1, 1]} : vector<224x128xbf16> to vector<16x128xbf16>
    %c16_52 = arith.constant 16 : index
    %c0_53 = arith.constant 0 : index
    %74 = vector.load %arg11[%c16_52, %c0_53] : memref<224x128xbf16, #tpu.memory_space<vmem>>, vector<16x128xbf16>
    tpu.vector_store %arg11[%c16_52, %c0_53], %73 {strides = array<i32>} : memref<224x128xbf16, #tpu.memory_space<vmem>>, vector<16x128xbf16>,
    %75 = vector.extract_strided_slice %14 {offsets = [80, 0], sizes = [16, 128], strides = [1, 1]} : vector<224x128xbf16> to vector<16x128xbf16>
    %c32_54 = arith.constant 32 : index
    %c0_55 = arith.constant 0 : index
    %76 = vector.load %arg11[%c32_54, %c0_55] : memref<224x128xbf16, #tpu.memory_space<vmem>>, vector<16x128xbf16>
    tpu.vector_store %arg11[%c32_54, %c0_55], %75 {strides = array<i32>} : memref<224x128xbf16, #tpu.memory_space<vmem>>, vector<16x128xbf16>,
    %77 = vector.extract_strided_slice %14 {offsets = [112, 0], sizes = [16, 128], strides = [1, 1]} : vector<224x128xbf16> to vector<16x128xbf16>
    %c48_56 = arith.constant 48 : index
    %c0_57 = arith.constant 0 : index
    %78 = vector.load %arg11[%c48_56, %c0_57] : memref<224x128xbf16, #tpu.memory_space<vmem>>, vector<16x128xbf16>
    tpu.vector_store %arg11[%c48_56, %c0_57], %77 {strides = array<i32>} : memref<224x128xbf16, #tpu.memory_space<vmem>>, vector<16x128xbf16>,
    %79 = vector.extract_strided_slice %14 {offsets = [144, 0], sizes = [16, 128], strides = [1, 1]} : vector<224x128xbf16> to vector<16x128xbf16>
    %c64_58 = arith.constant 64 : index
    %c0_59 = arith.constant 0 : index
    %80 = vector.load %arg11[%c64_58, %c0_59] : memref<224x128xbf16, #tpu.memory_space<vmem>>, vector<16x128xbf16>
    tpu.vector_store %arg11[%c64_58, %c0_59], %79 {strides = array<i32>} : memref<224x128xbf16, #tpu.memory_space<vmem>>, vector<16x128xbf16>,
    %81 = vector.extract_strided_slice %14 {offsets = [176, 0], sizes = [16, 128], strides = [1, 1]} : vector<224x128xbf16> to vector<16x128xbf16>
    %c80_60 = arith.constant 80 : index
    %c0_61 = arith.constant 0 : index
    %82 = vector.load %arg11[%c80_60, %c0_61] : memref<224x128xbf16, #tpu.memory_space<vmem>>, vector<16x128xbf16>
    tpu.vector_store %arg11[%c80_60, %c0_61], %81 {strides = array<i32>} : memref<224x128xbf16, #tpu.memory_space<vmem>>, vector<16x128xbf16>,
    %83 = vector.extract_strided_slice %14 {offsets = [208, 0], sizes = [16, 128], strides = [1, 1]} : vector<224x128xbf16> to vector<16x128xbf16>
    %c96_62 = arith.constant 96 : index
    %c0_63 = arith.constant 0 : index
    %84 = vector.load %arg11[%c96_62, %c0_63] : memref<224x128xbf16, #tpu.memory_space<vmem>>, vector<16x128xbf16>
    tpu.vector_store %arg11[%c96_62, %c0_63], %83 {strides = array<i32>} : memref<224x128xbf16, #tpu.memory_space<vmem>>, vector<16x128xbf16>,
    %85 = vector.extract_strided_slice %14 {offsets = [32, 0], sizes = [16, 128], strides = [1, 1]} : vector<224x128xbf16> to vector<16x128xbf16>
    %c112_64 = arith.constant 112 : index
    %c0_65 = arith.constant 0 : index
    %86 = vector.load %arg11[%c112_64, %c0_65] : memref<224x128xbf16, #tpu.memory_space<vmem>>, vector<16x128xbf16>
    tpu.vector_store %arg11[%c112_64, %c0_65], %85 {strides = array<i32>} : memref<224x128xbf16, #tpu.memory_space<vmem>>, vector<16x128xbf16>,
    %87 = vector.extract_strided_slice %14 {offsets = [64, 0], sizes = [16, 128], strides = [1, 1]} : vector<224x128xbf16> to vector<16x128xbf16>
    %c128_66 = arith.constant 128 : index
    %c0_67 = arith.constant 0 : index
    %88 = vector.load %arg11[%c128_66, %c0_67] : memref<224x128xbf16, #tpu.memory_space<vmem>>, vector<16x128xbf16>
    tpu.vector_store %arg11[%c128_66, %c0_67], %87 {strides = array<i32>} : memref<224x128xbf16, #tpu.memory_space<vmem>>, vector<16x128xbf16>,
    %89 = vector.extract_strided_slice %14 {offsets = [96, 0], sizes = [16, 128], strides = [1, 1]} : vector<224x128xbf16> to vector<16x128xbf16>
    %c144_68 = arith.constant 144 : index
    %c0_69 = arith.constant 0 : index
    %90 = vector.load %arg11[%c144_68, %c0_69] : memref<224x128xbf16, #tpu.memory_space<vmem>>, vector<16x128xbf16>
    tpu.vector_store %arg11[%c144_68, %c0_69], %89 {strides = array<i32>} : memref<224x128xbf16, #tpu.memory_space<vmem>>, vector<16x128xbf16>,
    %91 = vector.extract_strided_slice %14 {offsets = [128, 0], sizes = [16, 128], strides = [1, 1]} : vector<224x128xbf16> to vector<16x128xbf16>
    %c160_70 = arith.constant 160 : index
    %c0_71 = arith.constant 0 : index
    %92 = vector.load %arg11[%c160_70, %c0_71] : memref<224x128xbf16, #tpu.memory_space<vmem>>, vector<16x128xbf16>
    tpu.vector_store %arg11[%c160_70, %c0_71], %91 {strides = array<i32>} : memref<224x128xbf16, #tpu.memory_space<vmem>>, vector<16x128xbf16>,
    %93 = vector.extract_strided_slice %14 {offsets = [160, 0], sizes = [16, 128], strides = [1, 1]} : vector<224x128xbf16> to vector<16x128xbf16>
    %c176_72 = arith.constant 176 : index
    %c0_73 = arith.constant 0 : index
    %94 = vector.load %arg11[%c176_72, %c0_73] : memref<224x128xbf16, #tpu.memory_space<vmem>>, vector<16x128xbf16>
    tpu.vector_store %arg11[%c176_72, %c0_73], %93 {strides = array<i32>} : memref<224x128xbf16, #tpu.memory_space<vmem>>, vector<16x128xbf16>,
    %95 = vector.extract_strided_slice %14 {offsets = [192, 0], sizes = [16, 128], strides = [1, 1]} : vector<224x128xbf16> to vector<16x128xbf16>
    %c192_74 = arith.constant 192 : index
    %c0_75 = arith.constant 0 : index
    %96 = vector.load %arg11[%c192_74, %c0_75] : memref<224x128xbf16, #tpu.memory_space<vmem>>, vector<16x128xbf16>
    tpu.vector_store %arg11[%c192_74, %c0_75], %95 {strides = array<i32>} : memref<224x128xbf16, #tpu.memory_space<vmem>>, vector<16x128xbf16>,
    %cst_76 = arith.constant 0.000000e+00 : bf16
    %97 = vector.broadcast %cst_76 : bf16 to vector<16x128xbf16>
    %c208_77 = arith.constant 208 : index
    %c0_78 = arith.constant 0 : index
    %98 = vector.load %arg11[%c208_77, %c0_78] : memref<224x128xbf16, #tpu.memory_space<vmem>>, vector<16x128xbf16>
    tpu.vector_store %arg11[%c208_77, %c0_78], %97 {strides = array<i32>} : memref<224x128xbf16, #tpu.memory_space<vmem>>, vector<16x128xbf16>,
    %c0_79 = arith.constant 0 : index
    %c0_80 = arith.constant 0 : index
    %99 = vector.load %arg9[%c0_79, %c0_80] : memref<224x128xbf16, #tpu.memory_space<vmem>>, vector<224x128xbf16>
    %c0_81 = arith.constant 0 : index
    %c0_82 = arith.constant 0 : index
    %c0_83 = arith.constant 0 : index
    %100 = vector.load %arg4[%c0_81, %c0_82, %c0_83] : memref<3x128x256xbf16, #tpu.memory_space<vmem>>, vector<1x128x256xbf16>
    %101 = vector.shape_cast %100 : vector<1x128x256xbf16> to vector<128x256xbf16>
    %cst_84 = arith.constant dense<0.000000e+00> : vector<224x256xf32>
    %102 = tpu.matmul %99, %101, %cst_84 {dimension_numbers = #tpu.dot_dimension_numbers<[1], [0], [0], [1], [0, 0, 1, 1], [], []>} : vector<224x128xbf16>, vector<128x256xbf16>, vector<224x256xf32> -> vector<224x256xf32>
    %c0_85 = arith.constant 0 : index
    %c0_86 = arith.constant 0 : index
    %103 = vector.load %arg10[%c0_85, %c0_86] : memref<224x128xbf16, #tpu.memory_space<vmem>>, vector<224x128xbf16>
    %c1 = arith.constant 1 : index
    %c0_87 = arith.constant 0 : index
    %c0_88 = arith.constant 0 : index
    %104 = vector.load %arg4[%c1, %c0_87, %c0_88] : memref<3x128x256xbf16, #tpu.memory_space<vmem>>, vector<1x128x256xbf16>
    %105 = vector.shape_cast %104 : vector<1x128x256xbf16> to vector<128x256xbf16>
    %cst_89 = arith.constant dense<0.000000e+00> : vector<224x256xf32>
    %106 = tpu.matmul %103, %105, %cst_89 {dimension_numbers = #tpu.dot_dimension_numbers<[1], [0], [0], [1], [0, 0, 1, 1], [], []>} : vector<224x128xbf16>, vector<128x256xbf16>, vector<224x256xf32> -> vector<224x256xf32>
    %107 = arith.addf %102, %106 : vector<224x256xf32>
    %c0_90 = arith.constant 0 : index
    %c0_91 = arith.constant 0 : index
    %108 = vector.load %arg11[%c0_90, %c0_91] : memref<224x128xbf16, #tpu.memory_space<vmem>>, vector<224x128xbf16>
    %c2 = arith.constant 2 : index
    %c0_92 = arith.constant 0 : index
    %c0_93 = arith.constant 0 : index
    %109 = vector.load %arg4[%c2, %c0_92, %c0_93] : memref<3x128x256xbf16, #tpu.memory_space<vmem>>, vector<1x128x256xbf16>
    %110 = vector.shape_cast %109 : vector<1x128x256xbf16> to vector<128x256xbf16>
    %cst_94 = arith.constant dense<0.000000e+00> : vector<224x256xf32>
    %111 = tpu.matmul %108, %110, %cst_94 {dimension_numbers = #tpu.dot_dimension_numbers<[1], [0], [0], [1], [0, 0, 1, 1], [], []>} : vector<224x128xbf16>, vector<128x256xbf16>, vector<224x256xf32> -> vector<224x256xf32>
    %112 = arith.addf %107, %111 : vector<224x256xf32>
    %113 = vector.extract_strided_slice %112 {offsets = [0, 0], sizes = [112, 256], strides = [1, 1]} : vector<224x256xf32> to vector<112x256xf32>
    %114 = vector.extract_strided_slice %112 {offsets = [112, 0], sizes = [112, 256], strides = [1, 1]} : vector<224x256xf32> to vector<112x256xf32>
    %115 = arith.maximumf %113, %114 : vector<112x256xf32>
    %116 = vector.extract_strided_slice %115 {offsets = [0, 0], sizes = [112, 128], strides = [1, 1]} : vector<112x256xf32> to vector<112x128xf32>
    %117 = vector.extract_strided_slice %115 {offsets = [0, 128], sizes = [112, 128], strides = [1, 1]} : vector<112x256xf32> to vector<112x128xf32>
    %118 = arith.maximumf %116, %117 : vector<112x128xf32>
    %c0_95 = arith.constant 0 : index
    %c0_96 = arith.constant 0 : index
    %119 = vector.load %arg5[%c0_95, %c0_96] : memref<1x128xf32, #tpu.memory_space<vmem>>, vector<1x128xf32>
    %120 = vector.broadcast %119 : vector<1x128xf32> to vector<112x128xf32>
    %121 = arith.addf %118, %120 : vector<112x128xf32>
    %cst_97 = arith.constant 0.000000e+00 : f32
    %122 = vector.broadcast %cst_97 : f32 to vector<112x128xf32>
    %123 = arith.maximumf %121, %122 : vector<112x128xf32>
    %124 = arith.truncf %123 : vector<112x128xf32> to vector<112x128xbf16>
    %cst_98 = arith.constant 0.000000e+00 : f32
    %125 = vector.broadcast %cst_98 : f32 to vector<16x128xf32>
    %c0_99 = arith.constant 0 : index
    %c0_100 = arith.constant 0 : index
    %126 = vector.load %arg7[%c0_99, %c0_100] : memref<1x128xf32, #tpu.memory_space<vmem>>, vector<1x128xf32>
    %127 = vector.broadcast %126 : vector<1x128xf32> to vector<16x128xf32>
    %128 = arith.addf %125, %127 : vector<16x128xf32>
    %129 = vector.extract_strided_slice %124 {offsets = [0, 0], sizes = [16, 128], strides = [1, 1]} : vector<112x128xbf16> to vector<16x128xbf16>
    %c0_101 = arith.constant 0 : index
    %c0_102 = arith.constant 0 : index
    %c0_103 = arith.constant 0 : index
    %130 = vector.load %arg6[%c0_101, %c0_102, %c0_103] : memref<7x128x128xbf16, #tpu.memory_space<vmem>>, vector<1x128x128xbf16>
    %131 = vector.shape_cast %130 : vector<1x128x128xbf16> to vector<128x128xbf16>
    %cst_104 = arith.constant dense<0.000000e+00> : vector<16x128xf32>
    %132 = tpu.matmul %129, %131, %cst_104 {dimension_numbers = #tpu.dot_dimension_numbers<[1], [0], [0], [1], [0, 0, 1, 1], [], []>} : vector<16x128xbf16>, vector<128x128xbf16>, vector<16x128xf32> -> vector<16x128xf32>
    %133 = arith.addf %128, %132 : vector<16x128xf32>
    %134 = vector.extract_strided_slice %124 {offsets = [16, 0], sizes = [16, 128], strides = [1, 1]} : vector<112x128xbf16> to vector<16x128xbf16>
    %c1_105 = arith.constant 1 : index
    %c0_106 = arith.constant 0 : index
    %c0_107 = arith.constant 0 : index
    %135 = vector.load %arg6[%c1_105, %c0_106, %c0_107] : memref<7x128x128xbf16, #tpu.memory_space<vmem>>, vector<1x128x128xbf16>
    %136 = vector.shape_cast %135 : vector<1x128x128xbf16> to vector<128x128xbf16>
    %cst_108 = arith.constant dense<0.000000e+00> : vector<16x128xf32>
    %137 = tpu.matmul %134, %136, %cst_108 {dimension_numbers = #tpu.dot_dimension_numbers<[1], [0], [0], [1], [0, 0, 1, 1], [], []>} : vector<16x128xbf16>, vector<128x128xbf16>, vector<16x128xf32> -> vector<16x128xf32>
    %138 = arith.addf %133, %137 : vector<16x128xf32>
    %139 = vector.extract_strided_slice %124 {offsets = [32, 0], sizes = [16, 128], strides = [1, 1]} : vector<112x128xbf16> to vector<16x128xbf16>
    %c2_109 = arith.constant 2 : index
    %c0_110 = arith.constant 0 : index
    %c0_111 = arith.constant 0 : index
    %140 = vector.load %arg6[%c2_109, %c0_110, %c0_111] : memref<7x128x128xbf16, #tpu.memory_space<vmem>>, vector<1x128x128xbf16>
    %141 = vector.shape_cast %140 : vector<1x128x128xbf16> to vector<128x128xbf16>
    %cst_112 = arith.constant dense<0.000000e+00> : vector<16x128xf32>
    %142 = tpu.matmul %139, %141, %cst_112 {dimension_numbers = #tpu.dot_dimension_numbers<[1], [0], [0], [1], [0, 0, 1, 1], [], []>} : vector<16x128xbf16>, vector<128x128xbf16>, vector<16x128xf32> -> vector<16x128xf32>
    %143 = arith.addf %138, %142 : vector<16x128xf32>
    %144 = vector.extract_strided_slice %124 {offsets = [48, 0], sizes = [16, 128], strides = [1, 1]} : vector<112x128xbf16> to vector<16x128xbf16>
    %c3 = arith.constant 3 : index
    %c0_113 = arith.constant 0 : index
    %c0_114 = arith.constant 0 : index
    %145 = vector.load %arg6[%c3, %c0_113, %c0_114] : memref<7x128x128xbf16, #tpu.memory_space<vmem>>, vector<1x128x128xbf16>
    %146 = vector.shape_cast %145 : vector<1x128x128xbf16> to vector<128x128xbf16>
    %cst_115 = arith.constant dense<0.000000e+00> : vector<16x128xf32>
    %147 = tpu.matmul %144, %146, %cst_115 {dimension_numbers = #tpu.dot_dimension_numbers<[1], [0], [0], [1], [0, 0, 1, 1], [], []>} : vector<16x128xbf16>, vector<128x128xbf16>, vector<16x128xf32> -> vector<16x128xf32>
    %148 = arith.addf %143, %147 : vector<16x128xf32>
    %149 = vector.extract_strided_slice %124 {offsets = [64, 0], sizes = [16, 128], strides = [1, 1]} : vector<112x128xbf16> to vector<16x128xbf16>
    %c4 = arith.constant 4 : index
    %c0_116 = arith.constant 0 : index
    %c0_117 = arith.constant 0 : index
    %150 = vector.load %arg6[%c4, %c0_116, %c0_117] : memref<7x128x128xbf16, #tpu.memory_space<vmem>>, vector<1x128x128xbf16>
    %151 = vector.shape_cast %150 : vector<1x128x128xbf16> to vector<128x128xbf16>
    %cst_118 = arith.constant dense<0.000000e+00> : vector<16x128xf32>
    %152 = tpu.matmul %149, %151, %cst_118 {dimension_numbers = #tpu.dot_dimension_numbers<[1], [0], [0], [1], [0, 0, 1, 1], [], []>} : vector<16x128xbf16>, vector<128x128xbf16>, vector<16x128xf32> -> vector<16x128xf32>
    %153 = arith.addf %148, %152 : vector<16x128xf32>
    %154 = vector.extract_strided_slice %124 {offsets = [80, 0], sizes = [16, 128], strides = [1, 1]} : vector<112x128xbf16> to vector<16x128xbf16>
    %c5 = arith.constant 5 : index
    %c0_119 = arith.constant 0 : index
    %c0_120 = arith.constant 0 : index
    %155 = vector.load %arg6[%c5, %c0_119, %c0_120] : memref<7x128x128xbf16, #tpu.memory_space<vmem>>, vector<1x128x128xbf16>
    %156 = vector.shape_cast %155 : vector<1x128x128xbf16> to vector<128x128xbf16>
    %cst_121 = arith.constant dense<0.000000e+00> : vector<16x128xf32>
    %157 = tpu.matmul %154, %156, %cst_121 {dimension_numbers = #tpu.dot_dimension_numbers<[1], [0], [0], [1], [0, 0, 1, 1], [], []>} : vector<16x128xbf16>, vector<128x128xbf16>, vector<16x128xf32> -> vector<16x128xf32>
    %158 = arith.addf %153, %157 : vector<16x128xf32>
    %159 = vector.extract_strided_slice %124 {offsets = [96, 0], sizes = [16, 128], strides = [1, 1]} : vector<112x128xbf16> to vector<16x128xbf16>
    %c6 = arith.constant 6 : index
    %c0_122 = arith.constant 0 : index
    %c0_123 = arith.constant 0 : index
    %160 = vector.load %arg6[%c6, %c0_122, %c0_123] : memref<7x128x128xbf16, #tpu.memory_space<vmem>>, vector<1x128x128xbf16>
    %161 = vector.shape_cast %160 : vector<1x128x128xbf16> to vector<128x128xbf16>
    %cst_124 = arith.constant dense<0.000000e+00> : vector<16x128xf32>
    %162 = tpu.matmul %159, %161, %cst_124 {dimension_numbers = #tpu.dot_dimension_numbers<[1], [0], [0], [1], [0, 0, 1, 1], [], []>} : vector<16x128xbf16>, vector<128x128xbf16>, vector<16x128xf32> -> vector<16x128xf32>
    %163 = arith.addf %158, %162 : vector<16x128xf32>
    %cst_125 = arith.constant dense<0xFF800000> : vector<16xf32>
    %164 = vector.multi_reduction <maximumf>, %163, %cst_125 [1] : vector<16x128xf32> to vector<16xf32>
    %165 = vector.shape_cast %164 : vector<16xf32> to vector<16x1xf32>
    %166 = vector.broadcast %165 : vector<16x1xf32> to vector<16x128xf32>
    %167 = arith.subf %163, %166 : vector<16x128xf32>
    %168 = math.exp %167 : vector<16x128xf32>
    %169 = vector.broadcast %165 : vector<16x1xf32> to vector<16x128xf32>
    %170 = arith.subf %163, %169 : vector<16x128xf32>
    %cst_126 = arith.constant dense<0.000000e+00> : vector<16xf32>
    %171 = vector.multi_reduction <add>, %168, %cst_126 [1] : vector<16x128xf32> to vector<16xf32>
    %172 = vector.shape_cast %171 : vector<16xf32> to vector<16x1xf32>
    %173 = math.log %172 : vector<16x1xf32>
    %174 = vector.broadcast %173 : vector<16x1xf32> to vector<16x128xf32>
    %175 = arith.subf %170, %174 : vector<16x128xf32>
    %c0_127 = arith.constant 0 : index
    %c0_128 = arith.constant 0 : index
    %176 = vector.load %arg8[%c0_127, %c0_128] : memref<16x128xf32, #tpu.memory_space<vmem>>, vector<16x128xf32>
    tpu.vector_store %arg8[%c0_127, %c0_128], %175 {strides = array<i32>} : memref<16x128xf32, #tpu.memory_space<vmem>>, vector<16x128xf32>,
    return
  }
  func.func @transform_0(%arg0: i32) -> (i32, i32) {
    %c0_i32 = arith.constant 0 : i32
    %c0_i32_0 = arith.constant 0 : i32
    return %arg0, %c0_i32 : i32, i32
  }
  func.func @transform_1(%arg0: i32) -> (i32, i32) {
    %c0_i32 = arith.constant 0 : i32
    %c0_i32_0 = arith.constant 0 : i32
    %c0_i32_1 = arith.constant 0 : i32
    return %c0_i32, %c0_i32_0 : i32, i32
  }
  func.func @transform_2(%arg0: i32) -> (i32, i32) {
    %c0_i32 = arith.constant 0 : i32
    %c0_i32_0 = arith.constant 0 : i32
    %c0_i32_1 = arith.constant 0 : i32
    return %c0_i32, %c0_i32_0 : i32, i32
  }
  func.func @transform_3(%arg0: i32) -> (i32, i32, i32) {
    %c0_i32 = arith.constant 0 : i32
    %c0_i32_0 = arith.constant 0 : i32
    %c0_i32_1 = arith.constant 0 : i32
    %c0_i32_2 = arith.constant 0 : i32
    return %c0_i32, %c0_i32_0, %c0_i32_1 : i32, i32, i32
  }
  func.func @transform_4(%arg0: i32) -> (i32, i32) {
    %c0_i32 = arith.constant 0 : i32
    %c0_i32_0 = arith.constant 0 : i32
    %c0_i32_1 = arith.constant 0 : i32
    return %c0_i32, %c0_i32_0 : i32, i32
  }
  func.func @transform_5(%arg0: i32) -> (i32, i32, i32) {
    %c0_i32 = arith.constant 0 : i32
    %c0_i32_0 = arith.constant 0 : i32
    %c0_i32_1 = arith.constant 0 : i32
    %c0_i32_2 = arith.constant 0 : i32
    return %c0_i32, %c0_i32_0, %c0_i32_1 : i32, i32, i32
  }
  func.func @transform_6(%arg0: i32) -> (i32, i32) {
    %c0_i32 = arith.constant 0 : i32
    %c0_i32_0 = arith.constant 0 : i32
    %c0_i32_1 = arith.constant 0 : i32
    return %c0_i32, %c0_i32_0 : i32, i32
  }
  func.func @transform_7(%arg0: i32) -> (i32, i32) {
    %c0_i32 = arith.constant 0 : i32
    %c0_i32_0 = arith.constant 0 : i32
    return %arg0, %c0_i32 : i32, i32
  }
}

</mosaic_0001>

<bundles_post_ra>
// kernel: tile.18
= control target key start
LH: loop header
LB: loop body
LE: loop exit
PB: predicated region body
PF: predicated region fallthrough
CT: control target
= control target key end

     0   :  { %s22_s0 = inlined_call_operand.vmem [shape: f32[16], index: 0, kind: input, shape index: {}]   ;;  %s23_s1 = inlined_call_operand.vmem [shape: f32[7,16], index: 1, kind: output, shape index: {}]  }
   0x1   :  { %v4_v0 = vld [vmem:[%s22_s0] ss:$0 sm:$0xff] }
   0x2   :  { %5 = vst [vmem:[%s23_s1] sm:$0xff] %v4_v0 }

// kernel: tile.19
= control target key start
LH: loop header
LB: loop body
LE: loop exit
PB: predicated region body
PF: predicated region fallthrough
CT: control target
= control target key end

     0   :  { %s59_s10 = smov 96   ;;  %s60_s11 = smov 64   ;;  %vm3_vm0 = vcmask 130048   ;;  %vm9_vm1 = vcmask 917248   ;;  %vm15_vm2 = vcmask 786048   ;;  %vm21_vm3 = vcmask 654848   ;;  %s99_s0 = inlined_call_operand.vmem [shape: f32[7,16], index: 0, kind: input, shape index: {}]   ;;  %s100_s1 = inlined_call_operand.vmem [shape: f32[112], index: 1, kind: output, shape index: {}]  }
   0x1   :  { %v47_v0 = vld [vmem:[%s99_s0 + $0x6] sm:$0x1]   ;;  %v49_v1 = vld [vmem:[%s99_s0 + $0x4] sm:$0x1]   ;;  %v48_v2 = vld [vmem:[%s99_s0 + $0x5] sm:$0x1]  }
   0x2   :  { %7 = vrot.lane.b32.xlu0 %v47_v0, %s59_s10  ;;  %19 = vrot.lane.b32.xlu1 %v49_v1, %s60_s11  ;;  %v50_v3 = vld [vmem:[%s99_s0 + $0x3] sm:$0x1]   ;;  %v2_v4 = vld [vmem:[%s99_s0] sm:$0x1]   ;;  %s61_s18 = smov 80   ;;  %s62_s19 = smov 48  }
   0x3   :  { %4 = vst.msk [vmem:[#allocation0] sm:$0x1] %vm3_vm0, %v2_v4   ;;  %v51_v5 = vld [vmem:[%s99_s0 + $0x2] sm:$0x1]   ;;  %v52_v6 = vld [vmem:[%s99_s0 + $0x1] sm:$0x1]  }
   0x4   :  { %s63_s0 = smov 32   ;;  %s64_s24 = smov 16   ;;  %vm27_vm4 = vcmask 523648   ;;  %vm33_vm5 = vcmask 392448   ;;  %vm39_vm6 = vcmask 261248  }
   0x6   :  { %13 = vrot.lane.b32.xlu0 %v48_v2, %s61_s18  ;;  %25 = vrot.lane.b32.xlu1 %v50_v3, %s62_s19 }
   0xa   :  { %31 = vrot.lane.b32.xlu0 %v51_v5, %s63_s0  ;;  %37 = vrot.lane.b32.xlu1 %v52_v6, %s64_s24 }
  0x74   :  { %v8_v7 = vpop.permute.xlu0 %7   ;;  %v20_v8 = vpop.permute.xlu1 %19  }
  0x75   :  { %10 = vst.msk [vmem:[#allocation0] sm:$0x1] %vm9_vm1, %v8_v7  }
  0x78   :  { %v14_v9 = vpop.permute.xlu0 %13   ;;  %v26_v10 = vpop.permute.xlu1 %25  }
  0x79   :  { %16 = vst.msk [vmem:[#allocation0] sm:$0x1] %vm15_vm2, %v14_v9  }
  0x7a   :  { %22 = vst.msk [vmem:[#allocation0] sm:$0x1] %vm21_vm3, %v20_v8  }
  0x7b   :  { %28 = vst.msk [vmem:[#allocation0] sm:$0x1] %vm27_vm4, %v26_v10  }
  0x7c   :  { %v32_v11 = vpop.permute.xlu0 %31   ;;  %v38_v12 = vpop.permute.xlu1 %37  }
  0x7d   :  { %34 = vst.msk [vmem:[#allocation0] sm:$0x1] %vm33_vm5, %v32_v11  }
  0x7e   :  { %40 = vst.msk [vmem:[#allocation0] sm:$0x1] %vm39_vm6, %v38_v12  }
  0x85   :  { %v44_v13 = vld [vmem:[#allocation0] sm:$0x1] }
  0x86   :  { %46 = vst [vmem:[%s100_s1] sm:$0x1] %v44_v13 }

// kernel: smallconvnet_forward.1
= control target key start
LH: loop header
LB: loop body
LE: loop exit
PB: predicated region body
PF: predicated region fallthrough
CT: control target
= control target key end

     0   :  { %v4551_v1 = vmov 0   ;;  %vm378_vm0 = vcmask 1044480   ;;  %vm293_vm1 = vcmask 736256   ;;  %vm3525_vm2 = vmmov 0   ;;  %s4543_s1 = inlined_call_operand.vmem [shape: bf16[90,256], index: 1, kind: input, shape index: {}]   ;;  %s4544_s0 = inlined_call_operand.vmem [shape: bf16[448,90], index: 0, kind: input, shape index: {}]   ;;  %s4545_s3 = inlined_call_operand.vmem [shape: bf16[3,128,256], index: 3, kind: input, shape index: {}]   ;;  %s4546_s2 = inlined_call_operand.vmem [shape: f32[1,128], index: 2, kind: input, shape index: {}]   ;;  %s4547_s5 = inlined_call_operand.vmem [shape: bf16[7,128,128], index: 5, kind: input, shape index: {}]   ;;  %s4548_s4 = inlined_call_operand.vmem [shape: f32[1,128], index: 4, kind: input, shape index: {}]   ;;  %s4549_s6 = inlined_call_operand.vmem [shape: f32[1,128], index: 6, kind: input, shape index: {}]   ;;  %s4550_s7 = inlined_call_operand.vmem [shape: f32[16,128], index: 7, kind: output, shape index: {}]  }
   0x1   :  { %v3341_v0 = vld [vmem:[%s4543_s1 + $0x4] ss:$8 sps:$4 sm:$0xff]   ;;  %417 = vmatprep.mubr.bf16.mxu0 %v4551_v1  ;;  %647 = vmatprep.mubr.bf16.mxu1 %v4551_v1  ;;  %v3343_v2 = vld [vmem:[%s4543_s1] ss:$8 sps:$4 sm:$0xff]   ;;  %v3344_v3 = vld [vmem:[%s4543_s1 + $0x14] ss:$8 sps:$4 sm:$0xff]  }
   0x2   :  { %385 = vmatprep.subr.bf16.mxu0 %v3341_v0  ;;  %3188 = vmatprep.subr.bf16.mxu1 %v3341_v0  ;;  %v3346_v4 = vld [vmem:[%s4543_s1 + $0x10] ss:$8 sps:$4 sm:$0xff]   ;;  %v3347_v5 = vld [vmem:[%s4543_s1 + $0x24] ss:$8 sps:$4 sm:$0xff]   ;;  %v3349_v6 = vld [vmem:[%s4543_s1 + $0x20] ss:$8 sps:$4 sm:$0xff]  }
   0x3   :  { %386 = vmatpush1.bf16.msra.mxu0 %v3343_v2  ;;  %3194 = vmatpush1.bf16.msra.mxu1 %v3343_v2  ;;  %v3350_v7 = vld [vmem:[%s4543_s1 + $0x34] ss:$8 sps:$4 sm:$0xff]   ;;  %v3352_v8 = vld [vmem:[%s4543_s1 + $0x30] ss:$8 sps:$4 sm:$0xff]   ;;  %v3353_v9 = vld [vmem:[%s4543_s1 + $0x44] ss:$8 sps:$4 sm:$0xff]  }
   0x4   :  { %387 = vmatprep.subr.bf16.mxu0 %v3344_v3  ;;  %3189 = vmatprep.subr.bf16.mxu1 %v3344_v3  ;;  %v3356_v10 = vld [vmem:[%s4543_s1 + $0x54] ss:$8 sps:$4 sm:$0x1f]   ;;  %v3358_v11 = vld [vmem:[%s4543_s1 + $0x50] ss:$8 sps:$4 sm:$0x1f]  }
   0x5   :  { %v3355_v12 = vld [vmem:[%s4543_s1 + $0x40] ss:$8 sps:$4 sm:$0xff]   ;;  %v380_v13 = vsel %vm378_vm0, %v3358_v11, 0  ;;  %v3369_v15 = vld [vmem:[%s4544_s0 + $0xb8] sm:$0xff]   ;;  %v3361_v18 = vld [vmem:[%s4544_s0 + $0x10] sm:$0xff]  }
   0x6   :  { %v3359_v14 = vld [vmem:[%s4544_s0] sm:$0xff]   ;;  %v3360_v16 = vld [vmem:[%s4544_s0 + $0x8] sm:$0xff]   ;;  %v3362_v20 = vld [vmem:[%s4544_s0 + $0x18] sm:$0xff]  }
   0x7   :  { %388 = vmatpush1.bf16.msra.mxu0 %v3346_v4  ;;  %3195 = vmatpush1.bf16.msra.mxu1 %v3346_v4  ;;  %v3371_v17 = vld [vmem:[%s4544_s0 + $0xc0] sm:$0xff]   ;;  %v3373_v19 = vld [vmem:[%s4544_s0 + $0xc8] sm:$0xff]   ;;  %v3375_v21 = vld [vmem:[%s4544_s0 + $0xd0] sm:$0xff]  }
   0x8   :  { %389 = vmatprep.subr.bf16.mxu0 %v3347_v5  ;;  %3190 = vmatprep.subr.bf16.mxu1 %v3347_v5  ;;  %v3363_v22 = vld [vmem:[%s4544_s0 + $0x20] sm:$0xff]   ;;  %v3377_v23 = vld [vmem:[%s4544_s0 + $0xd8] sm:$0xff]   ;;  %v3364_v24 = vld [vmem:[%s4544_s0 + $0x28] sm:$0xff]  }
   0x9   :  { %v3365_v25 = vld [vmem:[%s4544_s0 + $0x30] sm:$0xff]   ;;  %v3366_v26 = vld [vmem:[%s4544_s0 + $0x38] sm:$0xff]   ;;  %v3367_v27 = vld [vmem:[%s4544_s0 + $0x40] sm:$0xff]  }
   0xa   :  { %v3368_v28 = vld [vmem:[%s4544_s0 + $0x48] sm:$0xff]   ;;  %v3370_v29 = vld [vmem:[%s4544_s0 + $0x50] sm:$0xff]   ;;  %v3372_v30 = vld [vmem:[%s4544_s0 + $0x58] sm:$0xff]  }
   0xb   :  { %390 = vmatpush1.bf16.msra.mxu0 %v3349_v6  ;;  %3196 = vmatpush1.bf16.msra.mxu1 %v3349_v6  ;;  %v3374_v31 = vld [vmem:[%s4544_s0 + $0x60] sm:$0xff]   ;;  %v3376_v32 = vld [vmem:[%s4544_s0 + $0x68] sm:$0xff]   ;;  %v3378_v33 = vld [vmem:[%s4544_s0 + $0x70] sm:$0xff]  }
   0xc   :  { %391 = vmatprep.subr.bf16.mxu0 %v3350_v7  ;;  %3191 = vmatprep.subr.bf16.mxu1 %v3350_v7  ;;  %v3379_v34 = vld [vmem:[%s4544_s0 + $0x78] sm:$0xff]   ;;  %v3380_v35 = vld [vmem:[%s4544_s0 + $0x80] sm:$0xff]   ;;  %v3381_v36 = vld [vmem:[%s4544_s0 + $0x88] sm:$0xff]  }
   0xd   :  { %v3382_v37 = vld [vmem:[%s4544_s0 + $0x90] sm:$0xff]   ;;  %v3383_v38 = vld [vmem:[%s4544_s0 + $0x98] sm:$0xff]   ;;  %v3384_v39 = vld [vmem:[%s4544_s0 + $0xa0] sm:$0xff]  }
   0xe   :  { %v3385_v40 = vld [vmem:[%s4544_s0 + $0xa8] sm:$0xff]   ;;  %v3386_v41 = vld [vmem:[%s4544_s0 + $0xb0] sm:$0xff]  }
   0xf   :  { %392 = vmatpush1.bf16.msra.mxu0 %v3352_v8  ;;  %3197 = vmatpush1.bf16.msra.mxu1 %v3352_v8  ;;  %v3389_v42 = vld [vmem:[%s4545_s3 + $0x84] ss:$8 sps:$4 sm:$0xff]   ;;  %v3387_v43 = vld [vmem:[%s4545_s3 + $0x80] ss:$8 sps:$4 sm:$0xff]   ;;  %v3392_v44 = vld [vmem:[%s4545_s3 + $0x94] ss:$8 sps:$4 sm:$0xff]  }
  0x10   :  { %393 = vmatprep.subr.bf16.mxu0 %v3353_v9  ;;  %3192 = vmatprep.subr.bf16.mxu1 %v3353_v9  ;;  %v3390_v45 = vld [vmem:[%s4545_s3 + $0x90] ss:$8 sps:$4 sm:$0xff]   ;;  %v3395_v46 = vld [vmem:[%s4545_s3 + $0xa4] ss:$8 sps:$4 sm:$0xff]   ;;  %v3393_v47 = vld [vmem:[%s4545_s3 + $0xa0] ss:$8 sps:$4 sm:$0xff]  }
  0x11   :  { %v3398_v48 = vld [vmem:[%s4545_s3 + $0xb4] ss:$8 sps:$4 sm:$0xff]   ;;  %v3396_v49 = vld [vmem:[%s4545_s3 + $0xb0] ss:$8 sps:$4 sm:$0xff]   ;;  %v3401_v50 = vld [vmem:[%s4545_s3 + $0xc4] ss:$8 sps:$4 sm:$0xff]  }
  0x12   :  { %v3399_v51 = vld [vmem:[%s4545_s3 + $0xc0] ss:$8 sps:$4 sm:$0xff]   ;;  %v3404_v52 = vld [vmem:[%s4545_s3 + $0xd4] ss:$8 sps:$4 sm:$0xff]   ;;  %v3402_v53 = vld [vmem:[%s4545_s3 + $0xd0] ss:$8 sps:$4 sm:$0xff]  }
  0x13   :  { %394 = vmatpush1.bf16.msra.mxu0 %v3355_v12  ;;  %3198 = vmatpush1.bf16.msra.mxu1 %v3355_v12  ;;  %v3407_v54 = vld [vmem:[%s4545_s3 + $0xe4] ss:$8 sps:$4 sm:$0xff]   ;;  %v3405_v55 = vld [vmem:[%s4545_s3 + $0xe0] ss:$8 sps:$4 sm:$0xff]   ;;  %v3410_v56 = vld [vmem:[%s4545_s3 + $0xf4] ss:$8 sps:$4 sm:$0xff]  }
  0x14   :  { %2721 = vmatprep.subr.msk.bf16.mxu0 %vm378_vm0, %v3356_v10  ;;  %3193 = vmatprep.subr.msk.bf16.mxu1 %vm378_vm0, %v3356_v10  ;;  %v3408_v57 = vld [vmem:[%s4545_s3 + $0xf0] ss:$8 sps:$4 sm:$0xff]  }
  0x17   :  { %396 = vmatpush1.bf16.msra.mxu0 %v380_v13  ;;  %3199 = vmatpush1.bf16.msra.mxu1 %v380_v13 }
  0x18   :  { %1042 = vmatprep.subr.bf16.mxu1 %v3389_v42 }
  0x1a   :  { %2722 = vmatmul.mubr.msk.bf16.vlgmr.msra.gmra.mrb[0].mxu0 %vm293_vm1, %v3359_v14  ;;  %2745 = vmatmul.mubr.msk.bf16.vlgmr.msra.gmra.mrb[0].mxu1 %vm293_vm1, %v3369_v15 }
  0x1b   :  { %427 = vmatprep.mubr.bf16.mxu0 %v4551_v1  ;;  %657 = vmatprep.mubr.bf16.mxu1 %v4551_v1 }
  0x1c   :  { %1043 = vmatpush1.bf16.msra.mxu1 %v3387_v43 }
  0x1d   :  { %1044 = vmatprep.subr.bf16.mxu1 %v3392_v44 }
  0x20   :  { %1045 = vmatpush1.bf16.msra.mxu1 %v3390_v45 }
  0x21   :  { %1046 = vmatprep.subr.bf16.mxu1 %v3395_v46 }
  0x22   :  { %2723 = vmatmul.mubr.msk.bf16.gmra.mrb[4].mxu0 %vm293_vm1, %v3360_v16  ;;  %2746 = vmatmul.mubr.msk.bf16.gmra.mrb[4].mxu1 %vm293_vm1, %v3371_v17 }
  0x23   :  { %437 = vmatprep.mubr.bf16.mxu0 %v4551_v1  ;;  %667 = vmatprep.mubr.bf16.mxu1 %v4551_v1 }
  0x24   :  { %1047 = vmatpush1.bf16.msra.mxu1 %v3393_v47 }
  0x25   :  { %1048 = vmatprep.subr.bf16.mxu1 %v3398_v48 }
  0x28   :  { %1049 = vmatpush1.bf16.msra.mxu1 %v3396_v49 }
  0x29   :  { %1050 = vmatprep.subr.bf16.mxu1 %v3401_v50 }
  0x2a   :  { %2724 = vmatmul.mubr.msk.bf16.gmra.mrb[8].mxu0 %vm293_vm1, %v3361_v18  ;;  %2747 = vmatmul.mubr.msk.bf16.gmra.mrb[8].mxu1 %vm293_vm1, %v3373_v19 }
  0x2b   :  { %447 = vmatprep.mubr.bf16.mxu0 %v4551_v1  ;;  %677 = vmatprep.mubr.bf16.mxu1 %v4551_v1 }
  0x2c   :  { %1051 = vmatpush1.bf16.msra.mxu1 %v3399_v51 }
  0x2d   :  { %1052 = vmatprep.subr.bf16.mxu1 %v3404_v52 }
  0x30   :  { %1053 = vmatpush1.bf16.msra.mxu1 %v3402_v53 }
  0x31   :  { %1054 = vmatprep.subr.bf16.mxu1 %v3407_v54 }
  0x32   :  { %2725 = vmatmul.mubr.msk.bf16.gmra.mrb[12].mxu0 %vm293_vm1, %v3362_v20  ;;  %2748 = vmatmul.mubr.msk.bf16.gmra.mrb[12].mxu1 %vm293_vm1, %v3375_v21 }
  0x33   :  { %457 = vmatprep.mubr.bf16.mxu0 %v4551_v1  ;;  %687 = vmatprep.mubr.bf16.mxu1 %v4551_v1 }
  0x34   :  { %1055 = vmatpush1.bf16.msra.mxu1 %v3405_v55 }
  0x35   :  { %1056 = vmatprep.subr.bf16.mxu1 %v3410_v56 }
  0x38   :  { %1057 = vmatpush1.bf16.msra.mxu1 %v3408_v57  ;;  %v3911_v57 = vld [vmem:[%s4546_s2] ss:$0 sm:$0xff] }
  0x3a   :  { %2726 = vmatmul.mubr.msk.bf16.gmra.mrb[16].mxu0 %vm293_vm1, %v3363_v22  ;;  %2749 = vmatmul.mubr.msk.bf16.gmra.mrb[16].mxu1 %vm293_vm1, %v3377_v23 }
  0x3b   :  { %467 = vmatprep.mubr.bf16.mxu0 %v4551_v1  ;;  %1074 = vmatprep.mubr.bf16.mxu1 %v4551_v1 }
  0x42   :  { %2727 = vmatmul.mubr.msk.bf16.gmra.mrb[20].mxu0 %vm293_vm1, %v3364_v24 }
  0x43   :  { %477 = vmatprep.mubr.bf16.mxu0 %v4551_v1 }
  0x4a   :  { %2728 = vmatmul.mubr.msk.bf16.gmra.mrb[24].mxu0 %vm293_vm1, %v3365_v25 }
  0x4b   :  { %487 = vmatprep.mubr.bf16.mxu0 %v4551_v1 }
  0x52   :  { %2729 = vmatmul.mubr.msk.bf16.gmra.mrb[28].mxu0 %vm293_vm1, %v3366_v26 }
  0x53   :  { %497 = vmatprep.mubr.bf16.mxu0 %v4551_v1 }
  0x5a   :  { %2730 = vmatmul.mubr.msk.bf16.gmra.mrb[32].mxu0 %vm293_vm1, %v3367_v27 }
  0x5b   :  { %507 = vmatprep.mubr.bf16.mxu0 %v4551_v1 }
  0x62   :  { %2731 = vmatmul.mubr.msk.bf16.gmra.mrb[36].mxu0 %vm293_vm1, %v3368_v28 }
  0x63   :  { %517 = vmatprep.mubr.bf16.mxu0 %v4551_v1 }
  0x6a   :  { %2732 = vmatmul.mubr.msk.bf16.gmra.mrb[40].mxu0 %vm293_vm1, %v3370_v29 }
  0x6b   :  { %527 = vmatprep.mubr.bf16.mxu0 %v4551_v1 }
  0x72   :  { %2733 = vmatmul.mubr.msk.bf16.gmra.mrb[44].mxu0 %vm293_vm1, %v3372_v30 }
  0x73   :  { %537 = vmatprep.mubr.bf16.mxu0 %v4551_v1 }
  0x7a   :  { %2734 = vmatmul.mubr.msk.bf16.gmra.mrb[48].mxu0 %vm293_vm1, %v3374_v31 }
  0x7b   :  { %547 = vmatprep.mubr.bf16.mxu0 %v4551_v1 }
  0x82   :  { %2735 = vmatmul.mubr.msk.bf16.gmra.mrb[52].mxu0 %vm293_vm1, %v3376_v32 }
  0x83   :  { %557 = vmatprep.mubr.bf16.mxu0 %v4551_v1 }
  0x8a   :  { %2736 = vmatmul.mubr.msk.bf16.gmra.mrb[56].mxu0 %vm293_vm1, %v3378_v33  ;;  %v3413_v33 = vld [vmem:[%s4545_s3 + $0x4] ss:$8 sps:$4 sm:$0xff]  }
  0x8b   :  { %567 = vmatprep.mubr.bf16.mxu0 %v4551_v1  ;;  %1295 = vmatprep.subr.bf16.mxu1 %v3413_v33 }
  0x92   :  { %2737 = vmatmul.mubr.msk.bf16.gmra.mrb[60].mxu0 %vm293_vm1, %v3379_v34 }
  0x93   :  { %577 = vmatprep.mubr.bf16.mxu0 %v4551_v1 }
  0x9a   :  { %2738 = vmatmul.mubr.msk.bf16.gmra.mrb[64].mxu0 %vm293_vm1, %v3380_v35 }
  0x9b   :  { %587 = vmatprep.mubr.bf16.mxu0 %v4551_v1 }
  0xa2   :  { %2739 = vmatmul.mubr.msk.bf16.gmra.mrb[68].mxu0 %vm293_vm1, %v3381_v36 }
  0xa3   :  { %597 = vmatprep.mubr.bf16.mxu0 %v4551_v1 }
  0xaa   :  { %2740 = vmatmul.mubr.msk.bf16.gmra.mrb[72].mxu0 %vm293_vm1, %v3382_v37 }
  0xab   :  { %607 = vmatprep.mubr.bf16.mxu0 %v4551_v1 }
  0xb2   :  { %2741 = vmatmul.mubr.msk.bf16.gmra.mrb[76].mxu0 %vm293_vm1, %v3383_v38 }
  0xb3   :  { %617 = vmatprep.mubr.bf16.mxu0 %v4551_v1 }
  0xba   :  { %2742 = vmatmul.mubr.msk.bf16.gmra.mrb[80].mxu0 %vm293_vm1, %v3384_v39 }
  0xbb   :  { %627 = vmatprep.mubr.bf16.mxu0 %v4551_v1 }
  0xc2   :  { %2743 = vmatmul.mubr.msk.bf16.gmra.mrb[84].mxu0 %vm293_vm1, %v3385_v40 }
  0xc3   :  { %637 = vmatprep.mubr.bf16.mxu0 %v4551_v1 }
  0xca   :  { %2744 = vmatmul.mubr.msk.bf16.gmra.mrb[88].mxu0 %vm293_vm1, %v3386_v41 }
  0xed   :  { %v3791_v58 = vpop.f32.mrb[0].mxu0  ;;  %v3793_v59 = vpop.f32.mrb[0].mxu1 }
  0xee   :  { %v3795_v60 = vpop.f32.mrb[1].mxu0  ;;  %v3797_v61 = vpop.f32.mrb[1].mxu1 }
  0xef   :  { %v3799_v62 = vpop.f32.mrb[2].mxu0  ;;  %v3801_v63 = vpop.f32.mrb[2].mxu1 }
  0xf0   :  { %v3803_v0 = vpop.f32.mrb[3].mxu0  ;;  %v3805_v2 = vpop.f32.mrb[3].mxu1 }
  0xf5   :  { %v3807_v3 = vpop.f32.mrb[4].mxu0  ;;  %v3809_v4 = vpop.f32.mrb[4].mxu1 }
  0xf6   :  { %v3811_v5 = vpop.f32.mrb[5].mxu0  ;;  %v3813_v6 = vpop.f32.mrb[5].mxu1 }
  0xf7   :  { %v3815_v7 = vpop.f32.mrb[6].mxu0  ;;  %v3817_v8 = vpop.f32.mrb[6].mxu1 }
  0xf8   :  { %v3819_v9 = vpop.f32.mrb[7].mxu0  ;;  %v3821_v10 = vpop.f32.mrb[7].mxu1 }
  0xfd   :  { %v3823_v11 = vpop.f32.mrb[8].mxu0  ;;  %v3825_v12 = vpop.f32.mrb[8].mxu1 }
  0xfe   :  { %v3827_v13 = vpop.f32.mrb[9].mxu0  ;;  %v3829_v14 = vpop.f32.mrb[9].mxu1 }
  0xff   :  { %v3831_v15 = vpop.f32.mrb[10].mxu0  ;;  %v3833_v16 = vpop.f32.mrb[10].mxu1 }
 0x100   :  { %v3835_v17 = vpop.f32.mrb[11].mxu0  ;;  %v3837_v18 = vpop.f32.mrb[11].mxu1 }
 0x105   :  { %v3839_v19 = vpop.f32.mrb[12].mxu0  ;;  %v3841_v20 = vpop.f32.mrb[12].mxu1 }
 0x106   :  { %v3843_v21 = vpop.f32.mrb[13].mxu0  ;;  %v3845_v22 = vpop.f32.mrb[13].mxu1 }
 0x107   :  { %v3847_v23 = vpop.f32.mrb[14].mxu0  ;;  %v3849_v24 = vpop.f32.mrb[14].mxu1 }
 0x108   :  { %v3851_v25 = vpop.f32.mrb[15].mxu0  ;;  %v3853_v26 = vpop.f32.mrb[15].mxu1 }
 0x10d   :  { %v3855_v27 = vpop.f32.mrb[16].mxu0  ;;  %v3857_v28 = vpop.f32.mrb[16].mxu1 }
 0x10e   :  { %v3859_v29 = vpop.f32.mrb[17].mxu0  ;;  %v3861_v30 = vpop.f32.mrb[17].mxu1 }
 0x10f   :  { %v3863_v31 = vpop.f32.mrb[18].mxu0  ;;  %v3865_v32 = vpop.f32.mrb[18].mxu1 }
 0x110   :  { %v3870_v34 = vpop.f32.mrb[19].mxu0  ;;  %v3872_v35 = vpop.f32.mrb[19].mxu1 }
 0x115   :  { %v3874_v36 = vpop.f32.mrb[20].mxu0 }
 0x116   :  { %v3876_v37 = vpop.f32.mrb[21].mxu0 }
 0x117   :  { %v3878_v38 = vpop.f32.mrb[22].mxu0 }
 0x118   :  { %v3880_v39 = vpop.f32.mrb[23].mxu0 }
 0x11d   :  { %v3882_v40 = vpop.f32.mrb[24].mxu0 }
 0x11e   :  { %v3884_v41 = vpop.f32.mrb[25].mxu0 }
 0x11f   :  { %v3886_v42 = vpop.f32.mrb[26].mxu0 }
 0x120   :  { %v3888_v43 = vpop.f32.mrb[27].mxu0 }
 0x125   :  { %v3890_v44 = vpop.f32.mrb[28].mxu0 }
 0x126   :  { %4553 = vst [vmem:[#allocation5_spill] sm:$0xff] %v3890_v44  ;;  %v3892_v45 = vpop.f32.mrb[29].mxu0 }
 0x127   :  { %4554 = vst [vmem:[#allocation6_spill] sm:$0xff] %v3892_v45  ;;  %v3894_v46 = vpop.f32.mrb[30].mxu0 }
 0x128   :  { %4555 = vst [vmem:[#allocation7_spill] sm:$0xff] %v3894_v46  ;;  %v3896_v47 = vpop.f32.mrb[31].mxu0 }
 0x129   :  { %4556 = vst [vmem:[#allocation8_spill] sm:$0xff] %v3896_v47 }
 0x12d   :  { %v3898_v48 = vpop.f32.mrb[32].mxu0 }
 0x12e   :  { %4557 = vst [vmem:[#allocation9_spill] sm:$0xff] %v3898_v48  ;;  %v3900_v49 = vpop.f32.mrb[33].mxu0 }
 0x12f   :  { %4558 = vst [vmem:[#allocation10_spill] sm:$0xff] %v3900_v49  ;;  %v3902_v50 = vpop.f32.mrb[34].mxu0 }
 0x130   :  { %4559 = vst [vmem:[#allocation11_spill] sm:$0xff] %v3902_v50  ;;  %v3904_v51 = vpop.f32.mrb[35].mxu0 }
 0x131   :  { %4560 = vst [vmem:[#allocation12_spill] sm:$0xff] %v3904_v51 }
 0x135   :  { %v509_v52 = vpop.f32.mrb[36].mxu0 }
 0x136   :  { %v734_v53 = vmax.f32 %v509_v52, %v3793_v59  ;;  %v511_v54 = vpop.f32.mrb[37].mxu0 }
 0x137   :  { %v735_v55 = vmax.f32 %v511_v54, %v3797_v61  ;;  %v513_v56 = vpop.f32.mrb[38].mxu0 }
 0x138   :  { %v736_v33 = vmax.f32 %v513_v56, %v3801_v63  ;;  %v515_v1 = vpop.f32.mrb[39].mxu0 }
 0x139   :  { %v772_v49 = vmax.f32 %v734_v53, %v735_v55  ;;  %v737_v50 = vmax.f32 %v515_v1, %v3805_v2 }
 0x13b   :  { %v807_v51 = vadd.f32 %v3911_v57, %v772_v49  ;;  %v773_v48 = vmax.f32 %v736_v33, %v737_v50 }
 0x13d   :  { %v808_v59 = vadd.f32 %v3911_v57, %v773_v48  ;;  %v519_v52 = vpop.f32.mrb[40].mxu0  ;;  %v835_v47 = vmax.f32 %v807_v51, 0.0 }
 0x13e   :  { %v738_v61 = vmax.f32 %v519_v52, %v3809_v4  ;;  %v521_v54 = vpop.f32.mrb[41].mxu0 }
 0x13f   :  { %v836_v46 = vmax.f32 %v808_v59, 0.0  ;;  %v739_v45 = vmax.f32 %v521_v54, %v3813_v6  ;;  %v523_v44 = vpop.f32.mrb[42].mxu0 }
 0x140   :  { %v740_v63 = vmax.f32 %v523_v44, %v3817_v8  ;;  %v525_v56 = vpop.f32.mrb[43].mxu0 }
 0x141   :  { %v774_v53 = vmax.f32 %v738_v61, %v739_v45  ;;  %v741_v1 = vmax.f32 %v525_v56, %v3821_v10  ;;  %v3921_v2 = vpack.c.bf16 %v836_v46, %v835_v47 }
 0x143   :  { %v809_v49 = vadd.f32 %v3911_v57, %v774_v53  ;;  %v775_v48 = vmax.f32 %v740_v63, %v741_v1 }
 0x145   :  { %v810_v50 = vadd.f32 %v3911_v57, %v775_v48  ;;  %v529_v4 = vpop.f32.mrb[44].mxu0  ;;  %v837_v33 = vmax.f32 %v809_v49, 0.0 }
 0x146   :  { %v742_v51 = vmax.f32 %v529_v4, %v3825_v12  ;;  %v531_v55 = vpop.f32.mrb[45].mxu0 }
 0x147   :  { %v838_v6 = vmax.f32 %v810_v50, 0.0  ;;  %v743_v59 = vmax.f32 %v531_v55, %v3829_v14  ;;  %v533_v8 = vpop.f32.mrb[46].mxu0 }
 0x148   :  { %v744_v44 = vmax.f32 %v533_v8, %v3833_v16  ;;  %v535_v45 = vpop.f32.mrb[47].mxu0 }
 0x149   :  { %v776_v10 = vmax.f32 %v742_v51, %v743_v59  ;;  %v745_v46 = vmax.f32 %v535_v45, %v3837_v18  ;;  %v3929_v47 = vpack.c.bf16 %v838_v6, %v837_v33 }
 0x14b   :  { %v811_v52 = vadd.f32 %v3911_v57, %v776_v10  ;;  %v777_v61 = vmax.f32 %v744_v44, %v745_v46 }
 0x14d   :  { %v812_v54 = vadd.f32 %v3911_v57, %v777_v61  ;;  %v539_v12 = vpop.f32.mrb[48].mxu0  ;;  %v839_v53 = vmax.f32 %v811_v52, 0.0 }
 0x14e   :  { %v746_v63 = vmax.f32 %v539_v12, %v3841_v20  ;;  %v541_v56 = vpop.f32.mrb[49].mxu0 }
 0x14f   :  { %v840_v14 = vmax.f32 %v812_v54, 0.0  ;;  %v747_v1 = vmax.f32 %v541_v56, %v3845_v22  ;;  %v543_v16 = vpop.f32.mrb[50].mxu0 }
 0x150   :  { %v748_v49 = vmax.f32 %v543_v16, %v3849_v24  ;;  %v545_v48 = vpop.f32.mrb[51].mxu0 }
 0x151   :  { %v778_v18 = vmax.f32 %v746_v63, %v747_v1  ;;  %v749_v50 = vmax.f32 %v545_v48, %v3853_v26  ;;  %v3937_v4 = vpack.c.bf16 %v840_v14, %v839_v53 }
 0x153   :  { %v813_v51 = vadd.f32 %v3911_v57, %v778_v18  ;;  %v779_v55 = vmax.f32 %v748_v49, %v749_v50 }
 0x155   :  { %v814_v33 = vadd.f32 %v3911_v57, %v779_v55  ;;  %v549_v20 = vpop.f32.mrb[52].mxu0  ;;  %v841_v8 = vmax.f32 %v813_v51, 0.0 }
 0x156   :  { %v750_v6 = vmax.f32 %v549_v20, %v3857_v28  ;;  %v551_v59 = vpop.f32.mrb[53].mxu0 }
 0x157   :  { %v842_v22 = vmax.f32 %v814_v33, 0.0  ;;  %v751_v44 = vmax.f32 %v551_v59, %v3861_v30  ;;  %v553_v24 = vpop.f32.mrb[54].mxu0 }
 0x158   :  { %v752_v45 = vmax.f32 %v553_v24, %v3865_v32  ;;  %v555_v10 = vpop.f32.mrb[55].mxu0 }
 0x159   :  { %v780_v26 = vmax.f32 %v750_v6, %v751_v44  ;;  %v753_v46 = vmax.f32 %v555_v10, %v3872_v35  ;;  %v3945_v52 = vpack.c.bf16 %v842_v22, %v841_v8  ;;  %v3414_v10 = vld [vmem:[%s4545_s3 + $0x10] ss:$8 sps:$4 sm:$0xff]  }
 0x15b   :  { %v815_v61 = vadd.f32 %v3911_v57, %v780_v26  ;;  %v781_v54 = vmax.f32 %v752_v45, %v753_v46 }
 0x15d   :  { %v816_v12 = vadd.f32 %v3911_v57, %v781_v54  ;;  %v559_v28 = vpop.f32.mrb[56].mxu0  ;;  %v843_v53 = vmax.f32 %v815_v61, 0.0 }
 0x15e   :  { %v698_v63 = vmax.f32 %v3791_v58, %v559_v28  ;;  %v561_v56 = vpop.f32.mrb[57].mxu0 }
 0x15f   :  { %v844_v30 = vmax.f32 %v816_v12, 0.0  ;;  %v699_v14 = vmax.f32 %v3795_v60, %v561_v56  ;;  %v563_v32 = vpop.f32.mrb[58].mxu0 }
 0x160   :  { %v700_v1 = vmax.f32 %v3799_v62, %v563_v32  ;;  %v565_v16 = vpop.f32.mrb[59].mxu0 }
 0x161   :  { %v754_v35 = vmax.f32 %v698_v63, %v699_v14  ;;  %v701_v49 = vmax.f32 %v3803_v0, %v565_v16  ;;  %v3953_v48 = vpack.c.bf16 %v844_v30, %v843_v53  ;;  %v3411_v0 = vld [vmem:[%s4545_s3] ss:$8 sps:$4 sm:$0xff]  }
 0x162   :  { %v3417_v14 = vld [vmem:[%s4545_s3 + $0x20] ss:$8 sps:$4 sm:$0xff]  }
 0x163   :  { %v789_v18 = vadd.f32 %v3911_v57, %v754_v35  ;;  %v755_v50 = vmax.f32 %v700_v1, %v701_v49 }
 0x165   :  { %v790_v51 = vadd.f32 %v3911_v57, %v755_v50  ;;  %v569_v58 = vpop.f32.mrb[60].mxu0  ;;  %v817_v20 = vmax.f32 %v789_v18, 0.0 }
 0x166   :  { %v702_v55 = vmax.f32 %v3807_v3, %v569_v58  ;;  %v571_v33 = vpop.f32.mrb[61].mxu0  ;;  %v3416_v3 = vld [vmem:[%s4545_s3 + $0x14] ss:$8 sps:$4 sm:$0xff]  }
 0x167   :  { %v818_v60 = vmax.f32 %v790_v51, 0.0  ;;  %v703_v6 = vmax.f32 %v3811_v5, %v571_v33  ;;  %v573_v62 = vpop.f32.mrb[62].mxu0 }
 0x168   :  { %v704_v59 = vmax.f32 %v3815_v7, %v573_v62  ;;  %v575_v8 = vpop.f32.mrb[63].mxu0  ;;  %v4561_v7 = vmov 0   ;;  %v3423_v62 = vld [vmem:[%s4545_s3 + $0x40] ss:$8 sps:$4 sm:$0xff]  }
 0x169   :  { %v3963_v22 = vpack.c.bf16 %v818_v60, %v817_v20  ;;  %v756_v44 = vmax.f32 %v702_v55, %v703_v6  ;;  %v705_v24 = vmax.f32 %v3819_v9, %v575_v8  ;;  %v3419_v9 = vld [vmem:[%s4545_s3 + $0x24] ss:$8 sps:$4 sm:$0xff]  }
 0x16b   :  { %v791_v45 = vadd.f32 %v3911_v57, %v756_v44  ;;  %v757_v5 = vmax.f32 %v704_v59, %v705_v24  ;;  %1075 = vmatmul.mubr.bf16.vlgmr.msra.gmra.mrb[20].mxu1 %v3963_v22 }
 0x16c   :  { %1084 = vmatprep.mubr.bf16.mxu1 %v4561_v7  ;;  %1296 = vmatpush1.bf16.msra.mxu1 %v3411_v0 }
 0x16d   :  { %v792_v26 = vadd.f32 %v3911_v57, %v757_v5  ;;  %v579_v46 = vpop.f32.mrb[64].mxu0  ;;  %1297 = vmatprep.subr.bf16.mxu1 %v3416_v3  ;;  %v819_v12 = vmax.f32 %v791_v45, 0.0  ;;  %v3431_v3 = vld [vmem:[%s4545_s3 + $0x64] ss:$8 sps:$4 sm:$0xff]  }
 0x16e   :  { %v706_v61 = vmax.f32 %v3823_v11, %v579_v46  ;;  %v581_v54 = vpop.f32.mrb[65].mxu0  ;;  %v3422_v11 = vld [vmem:[%s4545_s3 + $0x34] ss:$8 sps:$4 sm:$0xff]  }
 0x16f   :  { %v820_v28 = vmax.f32 %v792_v26, 0.0  ;;  %v707_v63 = vmax.f32 %v3827_v13, %v581_v54  ;;  %v583_v56 = vpop.f32.mrb[66].mxu0 }
 0x170   :  { %v708_v53 = vmax.f32 %v3831_v15, %v583_v56  ;;  %v585_v30 = vpop.f32.mrb[67].mxu0  ;;  %1298 = vmatpush1.bf16.msra.mxu1 %v3414_v10  ;;  %v3420_v15 = vld [vmem:[%s4545_s3 + $0x30] ss:$8 sps:$4 sm:$0xff]  }
 0x171   :  { %v758_v32 = vmax.f32 %v706_v61, %v707_v63  ;;  %v709_v1 = vmax.f32 %v3835_v17, %v585_v30  ;;  %1299 = vmatprep.subr.bf16.mxu1 %v3419_v9  ;;  %v3989_v16 = vpack.c.bf16 %v820_v28, %v819_v12  ;;  %v3425_v17 = vld [vmem:[%s4545_s3 + $0x44] ss:$8 sps:$4 sm:$0xff]   ;;  %v3429_v12 = vld [vmem:[%s4545_s3 + $0x60] ss:$8 sps:$4 sm:$0xff]  }
 0x173   :  { %v793_v13 = vadd.f32 %v3911_v57, %v758_v32  ;;  %v759_v35 = vmax.f32 %v708_v53, %v709_v1 }
 0x174   :  { %1300 = vmatpush1.bf16.msra.mxu1 %v3417_v14 }
 0x175   :  { %v794_v49 = vadd.f32 %v3911_v57, %v759_v35  ;;  %v589_v18 = vpop.f32.mrb[68].mxu0  ;;  %1301 = vmatprep.subr.bf16.mxu1 %v3422_v11  ;;  %v821_v58 = vmax.f32 %v793_v13, 0.0 }
 0x176   :  { %v710_v50 = vmax.f32 %v3839_v19, %v589_v18  ;;  %v591_v51 = vpop.f32.mrb[69].mxu0  ;;  %v3428_v19 = vld [vmem:[%s4545_s3 + $0x54] ss:$8 sps:$4 sm:$0xff]  }
 0x177   :  { %v822_v55 = vmax.f32 %v794_v49, 0.0  ;;  %v711_v33 = vmax.f32 %v3843_v21, %v591_v51  ;;  %v593_v20 = vpop.f32.mrb[70].mxu0 }
 0x178   :  { %v712_v60 = vmax.f32 %v3847_v23, %v593_v20  ;;  %v595_v6 = vpop.f32.mrb[71].mxu0  ;;  %1302 = vmatpush1.bf16.msra.mxu1 %v3420_v15  ;;  %v3426_v23 = vld [vmem:[%s4545_s3 + $0x50] ss:$8 sps:$4 sm:$0xff]  }
 0x179   :  { %v760_v59 = vmax.f32 %v710_v50, %v711_v33  ;;  %v713_v8 = vmax.f32 %v3851_v25, %v595_v6  ;;  %v4006_v0 = vpack.c.bf16 %v822_v55, %v821_v58  ;;  %1303 = vmatprep.subr.bf16.mxu1 %v3425_v17 }
 0x17b   :  { %v795_v21 = vadd.f32 %v3911_v57, %v760_v59  ;;  %v761_v44 = vmax.f32 %v712_v60, %v713_v8  ;;  %1085 = vmatmul.mubr.bf16.gmra.mrb[24].mxu1 %v4006_v0 }
 0x17c   :  { %1094 = vmatprep.mubr.bf16.mxu1 %v4561_v7  ;;  %1304 = vmatpush1.bf16.msra.mxu1 %v3423_v62 }
 0x17d   :  { %v796_v25 = vadd.f32 %v3911_v57, %v761_v44  ;;  %v599_v24 = vpop.f32.mrb[72].mxu0  ;;  %1305 = vmatprep.subr.bf16.mxu1 %v3428_v19  ;;  %v823_v10 = vmax.f32 %v795_v21, 0.0 }
 0x17e   :  { %v714_v45 = vmax.f32 %v3855_v27, %v599_v24  ;;  %v601_v5 = vpop.f32.mrb[73].mxu0  ;;  %v3434_v27 = vld [vmem:[%s4545_s3 + $0x74] ss:$8 sps:$4 sm:$0xff]   ;;  %v4562_v24 = vld [vmem:[#allocation5_spill] sm:$0xff] }
 0x17f   :  { %v824_v26 = vmax.f32 %v796_v25, 0.0  ;;  %v715_v46 = vmax.f32 %v3859_v29, %v601_v5  ;;  %v603_v9 = vpop.f32.mrb[74].mxu0 }
 0x180   :  { %v716_v61 = vmax.f32 %v3863_v31, %v603_v9  ;;  %v605_v54 = vpop.f32.mrb[75].mxu0  ;;  %1306 = vmatpush1.bf16.msra.mxu1 %v3426_v23  ;;  %v3432_v31 = vld [vmem:[%s4545_s3 + $0x70] ss:$8 sps:$4 sm:$0xff]  }
 0x181   :  { %v762_v28 = vmax.f32 %v714_v45, %v715_v46  ;;  %v717_v63 = vmax.f32 %v3870_v34, %v605_v54  ;;  %v4028_v56 = vpack.c.bf16 %v824_v26, %v823_v10  ;;  %1307 = vmatprep.subr.bf16.mxu1 %v3431_v3  ;;  %v3437_v34 = vld [vmem:[%s4545_s3 + $0x104] ss:$8 sps:$4 sm:$0xff]   ;;  %v4564_v46 = vld [vmem:[#allocation7_spill] sm:$0xff]  ;;  %v4565_v54 = vld [vmem:[#allocation8_spill] sm:$0xff] }
 0x182   :  { %v4563_v10 = vld [vmem:[#allocation6_spill] sm:$0xff] }
 0x183   :  { %v797_v29 = vadd.f32 %v3911_v57, %v762_v28  ;;  %v763_v53 = vmax.f32 %v716_v61, %v717_v63 }
 0x184   :  { %1308 = vmatpush1.bf16.msra.mxu1 %v3429_v12 }
 0x185   :  { %v798_v30 = vadd.f32 %v3911_v57, %v763_v53  ;;  %v609_v14 = vpop.f32.mrb[76].mxu0  ;;  %1309 = vmatprep.subr.bf16.mxu1 %v3434_v27  ;;  %v825_v11 = vmax.f32 %v797_v29, 0.0 }
 0x186   :  { %v718_v32 = vmax.f32 %v3874_v36, %v609_v14  ;;  %v611_v1 = vpop.f32.mrb[77].mxu0 }
 0x187   :  { %v826_v13 = vmax.f32 %v798_v30, 0.0  ;;  %v719_v35 = vmax.f32 %v3876_v37, %v611_v1  ;;  %v613_v15 = vpop.f32.mrb[78].mxu0  ;;  %v4567_v1 = vld [vmem:[#allocation10_spill] sm:$0xff] }
 0x188   :  { %v720_v49 = vmax.f32 %v3878_v38, %v613_v15  ;;  %v615_v18 = vpop.f32.mrb[79].mxu0  ;;  %1310 = vmatpush1.bf16.msra.mxu1 %v3432_v31  ;;  %v4566_v31 = vld [vmem:[#allocation9_spill] sm:$0xff] }
 0x189   :  { %v764_v17 = vmax.f32 %v718_v32, %v719_v35  ;;  %v721_v50 = vmax.f32 %v3880_v39, %v615_v18  ;;  %v4045_v51 = vpack.c.bf16 %v826_v13, %v825_v11  ;;  %1579 = vmatprep.subr.bf16.mxu1 %v3437_v34  ;;  %v4568_v35 = vld [vmem:[#allocation11_spill] sm:$0xff] }
 0x18b   :  { %v799_v58 = vadd.f32 %v3911_v57, %v764_v17  ;;  %v765_v55 = vmax.f32 %v720_v49, %v721_v50  ;;  %1095 = vmatmul.mubr.bf16.gmra.mrb[28].mxu1 %v4045_v51  ;;  %v4569_v17 = vld [vmem:[#allocation12_spill] sm:$0xff] }
 0x18c   :  { %1104 = vmatprep.mubr.bf16.mxu1 %v4561_v7 }
 0x18d   :  { %v800_v36 = vadd.f32 %v3911_v57, %v765_v55  ;;  %v619_v37 = vpop.f32.mrb[80].mxu0  ;;  %v827_v20 = vmax.f32 %v799_v58, 0.0 }
 0x18e   :  { %v722_v38 = vmax.f32 %v3882_v40, %v619_v37  ;;  %v621_v33 = vpop.f32.mrb[81].mxu0 }
 0x18f   :  { %v828_v60 = vmax.f32 %v800_v36, 0.0  ;;  %v723_v39 = vmax.f32 %v3884_v41, %v621_v33  ;;  %v623_v6 = vpop.f32.mrb[82].mxu0 }
 0x190   :  { %v724_v62 = vmax.f32 %v3886_v42, %v623_v6  ;;  %v625_v59 = vpop.f32.mrb[83].mxu0  ;;  %v3443_v6 = vld [vmem:[%s4545_s3 + $0x124] ss:$8 sps:$4 sm:$0xff]  }
 0x191   :  { %v766_v8 = vmax.f32 %v722_v38, %v723_v39  ;;  %v725_v19 = vmax.f32 %v3888_v43, %v625_v59  ;;  %v4055_v21 = vpack.c.bf16 %v828_v60, %v827_v20  ;;  %v3440_v60 = vld [vmem:[%s4545_s3 + $0x114] ss:$8 sps:$4 sm:$0xff]   ;;  %v3438_v39 = vld [vmem:[%s4545_s3 + $0x110] ss:$8 sps:$4 sm:$0xff]  }
 0x192   :  { %v3446_v59 = vld [vmem:[%s4545_s3 + $0x134] ss:$8 sps:$4 sm:$0xff]  }
 0x193   :  { %v801_v44 = vadd.f32 %v3911_v57, %v766_v8  ;;  %v767_v23 = vmax.f32 %v724_v62, %v725_v19  ;;  %v3441_v62 = vld [vmem:[%s4545_s3 + $0x120] ss:$8 sps:$4 sm:$0xff]   ;;  %v3444_v8 = vld [vmem:[%s4545_s3 + $0x130] ss:$8 sps:$4 sm:$0xff]   ;;  %v3449_v19 = vld [vmem:[%s4545_s3 + $0x144] ss:$8 sps:$4 sm:$0xff]  }
 0x195   :  { %v802_v25 = vadd.f32 %v3911_v57, %v767_v23  ;;  %v629_v40 = vpop.f32.mrb[84].mxu0  ;;  %v829_v5 = vmax.f32 %v801_v44, 0.0  ;;  %v3447_v44 = vld [vmem:[%s4545_s3 + $0x140] ss:$8 sps:$4 sm:$0xff]   ;;  %v3452_v23 = vld [vmem:[%s4545_s3 + $0x154] ss:$8 sps:$4 sm:$0xff]  }
 0x196   :  { %v726_v3 = vmax.f32 %v4562_v24, %v629_v40  ;;  %v631_v45 = vpop.f32.mrb[85].mxu0  ;;  %v3455_v40 = vld [vmem:[%s4545_s3 + $0x164] ss:$8 sps:$4 sm:$0xff]   ;;  %v3453_v24 = vld [vmem:[%s4545_s3 + $0x160] ss:$8 sps:$4 sm:$0xff]  }
 0x197   :  { %v830_v41 = vmax.f32 %v802_v25, 0.0  ;;  %v727_v26 = vmax.f32 %v4563_v10, %v631_v45  ;;  %v633_v42 = vpop.f32.mrb[86].mxu0  ;;  %v3450_v25 = vld [vmem:[%s4545_s3 + $0x150] ss:$8 sps:$4 sm:$0xff]  }
 0x198   :  { %v728_v9 = vmax.f32 %v4564_v46, %v633_v42  ;;  %v635_v61 = vpop.f32.mrb[87].mxu0  ;;  %v3456_v45 = vld [vmem:[%s4545_s3 + $0x170] ss:$8 sps:$4 sm:$0xff]   ;;  %v3463_v42 = vld [vmem:[%s4547_s5 + $0x20] sm:$0xff]  }
 0x199   :  { %v768_v43 = vmax.f32 %v726_v3, %v727_v26  ;;  %v729_v12 = vmax.f32 %v4565_v54, %v635_v61  ;;  %v4063_v28 = vpack.c.bf16 %v830_v41, %v829_v5  ;;  %v3458_v3 = vld [vmem:[%s4545_s3 + $0x174] ss:$8 sps:$4 sm:$0xff]   ;;  %v3524_v5 = vmov 0.0   ;;  %v3460_v41 = vld [vmem:[%s4547_s5 + $0x8] sm:$0xff]  }
 0x19a   :  { %3048 = vmatprep.subr.bf16.mxu0 %v3524_v5  ;;  %v3461_v10 = vld [vmem:[%s4547_s5 + $0x10] sm:$0xff]   ;;  %v3462_v26 = vld [vmem:[%s4547_s5 + $0x18] sm:$0xff]   ;;  %3064 = vmatprep.mubr.msk.bf16.mxu0 %vm3525_vm2, %v3524_v5 }
 0x19b   :  { %v803_v63 = vadd.f32 %v3911_v57, %v768_v43  ;;  %v769_v27 = vmax.f32 %v728_v9, %v729_v12  ;;  %1105 = vmatmul.mubr.bf16.gmra.mrb[32].mxu1 %v4063_v28 }
 0x19c   :  { %1114 = vmatprep.mubr.bf16.mxu1 %v4561_v7 }
 0x19d   :  { %v804_v29 = vadd.f32 %v3911_v57, %v769_v27  ;;  %v639_v53 = vpop.f32.mrb[88].mxu0  ;;  %v831_v34 = vmax.f32 %v803_v63, 0.0 }
 0x19e   :  { %v730_v30 = vmax.f32 %v4566_v31, %v639_v53  ;;  %v641_v14 = vpop.f32.mrb[89].mxu0 }
 0x19f   :  { %v832_v32 = vmax.f32 %v804_v29, 0.0  ;;  %v731_v11 = vmax.f32 %v4567_v1, %v641_v14  ;;  %v643_v13 = vpop.f32.mrb[90].mxu0 }
 0x1a0   :  { %v732_v15 = vmax.f32 %v4568_v35, %v643_v13  ;;  %v645_v49 = vpop.f32.mrb[91].mxu0 }
 0x1a1   :  { %v770_v18 = vmax.f32 %v730_v30, %v731_v11  ;;  %v733_v50 = vmax.f32 %v4569_v17, %v645_v49  ;;  %v4073_v58 = vpack.c.bf16 %v832_v32, %v831_v34 }
 0x1a3   :  { %v805_v55 = vadd.f32 %v3911_v57, %v770_v18  ;;  %v771_v36 = vmax.f32 %v732_v15, %v733_v50 }
 0x1a5   :  { %v806_v37 = vadd.f32 %v3911_v57, %v771_v36  ;;  %v833_v38 = vmax.f32 %v805_v55, 0.0  ;;  %v3435_v57 = vld [vmem:[%s4545_s3 + $0x100] ss:$8 sps:$4 sm:$0xff]  }
 0x1a7   :  { %v834_v33 = vmax.f32 %v806_v37, 0.0 }
 0x1a9   :  { %v4077_v20 = vpack.c.bf16 %v834_v33, %v833_v38 }
 0x1ab   :  { %1115 = vmatmul.mubr.bf16.gmra.mrb[36].mxu1 %v4077_v20 }
 0x1ac   :  { %1124 = vmatprep.mubr.bf16.mxu1 %v4561_v7 }
 0x1b3   :  { %1125 = vmatmul.mubr.bf16.gmra.mrb[40].mxu1 %v3929_v47 }
 0x1b4   :  { %1134 = vmatprep.mubr.bf16.mxu1 %v4561_v7 }
 0x1bb   :  { %1135 = vmatmul.mubr.bf16.gmra.mrb[44].mxu1 %v3945_v52 }
 0x1bc   :  { %1144 = vmatprep.mubr.bf16.mxu1 %v4561_v7 }
 0x1c3   :  { %1145 = vmatmul.mubr.bf16.gmra.mrb[48].mxu1 %v3989_v16 }
 0x1c4   :  { %1154 = vmatprep.mubr.bf16.mxu1 %v4561_v7 }
 0x1cb   :  { %1155 = vmatmul.mubr.bf16.gmra.mrb[52].mxu1 %v4028_v56 }
 0x1cc   :  { %1164 = vmatprep.mubr.bf16.mxu1 %v4561_v7 }
 0x1d3   :  { %1165 = vmatmul.mubr.bf16.gmra.mrb[56].mxu1 %v4055_v21 }
 0x1d4   :  { %1174 = vmatprep.mubr.bf16.mxu1 %v4561_v7 }
 0x1db   :  { %1175 = vmatmul.mubr.bf16.gmra.mrb[60].mxu1 %v4073_v58 }
 0x1dc   :  { %1184 = vmatprep.mubr.bf16.mxu1 %v4561_v7 }
 0x1e3   :  { %1185 = vmatmul.mubr.bf16.gmra.mrb[64].mxu1 %v3921_v2 }
 0x1e4   :  { %1194 = vmatprep.mubr.bf16.mxu1 %v4561_v7 }
 0x1eb   :  { %1195 = vmatmul.mubr.bf16.gmra.mrb[68].mxu1 %v3937_v4 }
 0x1ec   :  { %1204 = vmatprep.mubr.bf16.mxu1 %v4561_v7 }
 0x1f3   :  { %1205 = vmatmul.mubr.bf16.gmra.mrb[72].mxu1 %v3953_v48 }
 0x1f4   :  { %1327 = vmatprep.mubr.bf16.mxu1 %v4561_v7 }
 0x1fb   :  { %1328 = vmatmul.mubr.bf16.vlgmr.msra.gmra.mrb[20].mxu1 %v4561_v7 }
 0x1fc   :  { %1580 = vmatpush1.bf16.msra.mxu1 %v3435_v57  ;;  %1337 = vmatprep.mubr.bf16.mxu1 %v4561_v7 }
 0x1fd   :  { %1581 = vmatprep.subr.bf16.mxu1 %v3440_v60 }
 0x200   :  { %1582 = vmatpush1.bf16.msra.mxu1 %v3438_v39 }
 0x201   :  { %1583 = vmatprep.subr.bf16.mxu1 %v3443_v6 }
 0x203   :  { %1338 = vmatmul.mubr.bf16.gmra.mrb[24].mxu1 %v3989_v16 }
 0x204   :  { %1347 = vmatprep.mubr.bf16.mxu1 %v4561_v7  ;;  %1584 = vmatpush1.bf16.msra.mxu1 %v3441_v62 }
 0x205   :  { %1585 = vmatprep.subr.bf16.mxu1 %v3446_v59 }
 0x208   :  { %1586 = vmatpush1.bf16.msra.mxu1 %v3444_v8 }
 0x209   :  { %1587 = vmatprep.subr.bf16.mxu1 %v3449_v19 }
 0x20b   :  { %1348 = vmatmul.mubr.bf16.gmra.mrb[28].mxu1 %v4028_v56 }
 0x20c   :  { %1357 = vmatprep.mubr.bf16.mxu1 %v4561_v7  ;;  %1588 = vmatpush1.bf16.msra.mxu1 %v3447_v44 }
 0x20d   :  { %1589 = vmatprep.subr.bf16.mxu1 %v3452_v23 }
 0x210   :  { %1590 = vmatpush1.bf16.msra.mxu1 %v3450_v25  ;;  %v3467_v25 = vld [vmem:[%s4547_s5 + $0x40] sm:$0xff]  }
 0x211   :  { %1591 = vmatprep.subr.bf16.mxu1 %v3455_v40 }
 0x213   :  { %1358 = vmatmul.mubr.bf16.gmra.mrb[32].mxu1 %v4055_v21 }
 0x214   :  { %1367 = vmatprep.mubr.bf16.mxu1 %v4561_v7  ;;  %1592 = vmatpush1.bf16.msra.mxu1 %v3453_v24 }
 0x215   :  { %1593 = vmatprep.subr.bf16.mxu1 %v3458_v3 }
 0x218   :  { %1594 = vmatpush1.bf16.msra.mxu1 %v3456_v45 }
 0x21b   :  { %1368 = vmatmul.mubr.bf16.gmra.mrb[36].mxu1 %v4073_v58 }
 0x21c   :  { %1377 = vmatprep.mubr.bf16.mxu1 %v4561_v7 }
 0x223   :  { %1378 = vmatmul.mubr.bf16.gmra.mrb[40].mxu1 %v3921_v2 }
 0x224   :  { %1387 = vmatprep.mubr.bf16.mxu1 %v4561_v7 }
 0x22b   :  { %1388 = vmatmul.mubr.bf16.gmra.mrb[44].mxu1 %v3937_v4 }
 0x22c   :  { %1397 = vmatprep.mubr.bf16.mxu1 %v4561_v7 }
 0x233   :  { %1398 = vmatmul.mubr.bf16.gmra.mrb[48].mxu1 %v3963_v22  ;;  %v3459_v22 = vld [vmem:[%s4547_s5] sm:$0xff]  }
 0x234   :  { %1407 = vmatprep.mubr.bf16.mxu1 %v4561_v7  ;;  %3049 = vmatpush3.bf16.msra.mxu0 %v3459_v22 }
 0x235   :  { %3050 = vmatprep.subr.bf16.mxu0 %v3524_v5 }
 0x238   :  { %3051 = vmatpush3.bf16.msra.mxu0 %v3460_v41  ;;  %v3468_v41 = vld [vmem:[%s4547_s5 + $0x48] sm:$0xff]  }
 0x239   :  { %3052 = vmatprep.subr.bf16.mxu0 %v3524_v5 }
 0x23b   :  { %1408 = vmatmul.mubr.bf16.gmra.mrb[52].mxu1 %v4006_v0 }
 0x23c   :  { %1417 = vmatprep.mubr.bf16.mxu1 %v4561_v7  ;;  %3053 = vmatpush3.bf16.msra.mxu0 %v3461_v10 }
 0x23d   :  { %3054 = vmatprep.subr.bf16.mxu0 %v3524_v5 }
 0x240   :  { %3055 = vmatpush3.bf16.msra.mxu0 %v3462_v26 }
 0x241   :  { %3056 = vmatprep.subr.bf16.mxu0 %v3524_v5 }
 0x243   :  { %1418 = vmatmul.mubr.bf16.gmra.mrb[56].mxu1 %v4045_v51 }
 0x244   :  { %1427 = vmatprep.mubr.bf16.mxu1 %v4561_v7  ;;  %3057 = vmatpush3.bf16.msra.mxu0 %v3463_v42 }
 0x245   :  { %3058 = vmatprep.subr.bf16.mxu0 %v3524_v5 }
 0x24b   :  { %1428 = vmatmul.mubr.bf16.gmra.mrb[60].mxu1 %v4063_v28 }
 0x24c   :  { %1437 = vmatprep.mubr.bf16.mxu1 %v4561_v7 }
 0x253   :  { %1438 = vmatmul.mubr.bf16.gmra.mrb[64].mxu1 %v4077_v20 }
 0x254   :  { %1447 = vmatprep.mubr.bf16.mxu1 %v4561_v7 }
 0x25b   :  { %1448 = vmatmul.mubr.bf16.gmra.mrb[68].mxu1 %v3929_v47 }
 0x25c   :  { %1457 = vmatprep.mubr.bf16.mxu1 %v4561_v7 }
 0x263   :  { %1458 = vmatmul.mubr.bf16.gmra.mrb[72].mxu1 %v3945_v52 }
 0x264   :  { %1611 = vmatprep.mubr.bf16.mxu1 %v4561_v7 }
 0x26b   :  { %1612 = vmatmul.mubr.bf16.vlgmr.msra.gmra.mrb[20].mxu1 %v3989_v16 }
 0x26c   :  { %1621 = vmatprep.mubr.bf16.mxu1 %v4561_v7 }
 0x273   :  { %1622 = vmatmul.mubr.bf16.gmra.mrb[24].mxu1 %v4028_v56 }
 0x274   :  { %1631 = vmatprep.mubr.bf16.mxu1 %v4561_v7 }
 0x27b   :  { %1632 = vmatmul.mubr.bf16.gmra.mrb[28].mxu1 %v4055_v21 }
 0x27c   :  { %1641 = vmatprep.mubr.bf16.mxu1 %v4561_v7 }
 0x283   :  { %1642 = vmatmul.mubr.bf16.gmra.mrb[32].mxu1 %v4073_v58  ;;  %v4277_v58 = vld [vmem:[%s4548_s4] ss:$0 sm:$0xff] }
 0x284   :  { %1651 = vmatprep.mubr.bf16.mxu1 %v4561_v7 }
 0x28b   :  { %1652 = vmatmul.mubr.bf16.gmra.mrb[36].mxu1 %v3921_v2  ;;  %v3464_v2 = vld [vmem:[%s4547_s5 + $0x28] sm:$0xff]  }
 0x28c   :  { %1661 = vmatprep.mubr.bf16.mxu1 %v4561_v7  ;;  %3059 = vmatpush3.bf16.msra.mxu0 %v3464_v2 }
 0x28d   :  { %3060 = vmatprep.subr.bf16.mxu0 %v3524_v5 }
 0x293   :  { %1662 = vmatmul.mubr.bf16.gmra.mrb[40].mxu1 %v3937_v4  ;;  %v3465_v4 = vld [vmem:[%s4547_s5 + $0x30] sm:$0xff]  }
 0x294   :  { %1671 = vmatprep.mubr.bf16.mxu1 %v4561_v7  ;;  %3061 = vmatpush3.bf16.msra.mxu0 %v3465_v4 }
 0x295   :  { %3062 = vmatprep.subr.bf16.mxu0 %v3524_v5 }
 0x29b   :  { %1672 = vmatmul.mubr.bf16.gmra.mrb[44].mxu1 %v3953_v48  ;;  %v3466_v48 = vld [vmem:[%s4547_s5 + $0x38] sm:$0xff]  }
 0x29c   :  { %1681 = vmatprep.mubr.bf16.mxu1 %v4561_v7  ;;  %3063 = vmatpush3.bf16.msra.mxu0 %v3466_v48 }
 0x29d   :  { %3068 = vmatprep.subr.bf16.mxu0 %v3524_v5 }
 0x2a3   :  { %1682 = vmatmul.mubr.bf16.gmra.mrb[48].mxu1 %v4006_v0 }
 0x2a4   :  { %1691 = vmatprep.mubr.bf16.mxu1 %v4561_v7 }
 0x2ab   :  { %1692 = vmatmul.mubr.bf16.gmra.mrb[52].mxu1 %v4045_v51 }
 0x2ac   :  { %1701 = vmatprep.mubr.bf16.mxu1 %v4561_v7 }
 0x2b3   :  { %1702 = vmatmul.mubr.bf16.gmra.mrb[56].mxu1 %v4063_v28 }
 0x2b4   :  { %1711 = vmatprep.mubr.bf16.mxu1 %v4561_v7 }
 0x2bb   :  { %1712 = vmatmul.mubr.bf16.gmra.mrb[60].mxu1 %v4077_v20 }
 0x2bc   :  { %1721 = vmatprep.mubr.bf16.mxu1 %v4561_v7 }
 0x2c3   :  { %1722 = vmatmul.mubr.bf16.gmra.mrb[64].mxu1 %v3929_v47 }
 0x2c4   :  { %1731 = vmatprep.mubr.bf16.mxu1 %v4561_v7 }
 0x2cb   :  { %1732 = vmatmul.mubr.bf16.gmra.mrb[68].mxu1 %v3945_v52 }
 0x2cc   :  { %1741 = vmatprep.mubr.bf16.mxu1 %v4561_v7 }
 0x2d3   :  { %1742 = vmatmul.mubr.bf16.gmra.mrb[72].mxu1 %v4561_v7 }
 0x33e   :  { %v1613_v47 = vpop.f32.mrb[20].mxu1 }
 0x33f   :  { %v1615_v52 = vpop.f32.mrb[21].mxu1 }
 0x340   :  { %v1617_v7 = vpop.f32.mrb[22].mxu1 }
 0x341   :  { %v1619_v16 = vpop.f32.mrb[23].mxu1 }
 0x346   :  { %v1623_v0 = vpop.f32.mrb[24].mxu1 }
 0x347   :  { %v1625_v56 = vpop.f32.mrb[25].mxu1 }
 0x348   :  { %v1627_v51 = vpop.f32.mrb[26].mxu1 }
 0x349   :  { %v1629_v21 = vpop.f32.mrb[27].mxu1 }
 0x34e   :  { %v4234_v46 = vpop.f32.mrb[28].mxu1 }
 0x34f   :  { %v4236_v9 = vpop.f32.mrb[29].mxu1 }
 0x350   :  { %v4238_v61 = vpop.f32.mrb[30].mxu1 }
 0x351   :  { %v4240_v43 = vpop.f32.mrb[31].mxu1 }
 0x356   :  { %v4242_v54 = vpop.f32.mrb[32].mxu1 }
 0x357   :  { %v4244_v12 = vpop.f32.mrb[33].mxu1 }
 0x358   :  { %v4246_v28 = vpop.f32.mrb[34].mxu1 }
 0x359   :  { %v4248_v63 = vpop.f32.mrb[35].mxu1 }
 0x35e   :  { %v4250_v27 = vpop.f32.mrb[36].mxu1 }
 0x35f   :  { %v4252_v29 = vpop.f32.mrb[37].mxu1 }
 0x360   :  { %v4254_v53 = vpop.f32.mrb[38].mxu1 }
 0x361   :  { %v4256_v31 = vpop.f32.mrb[39].mxu1 }
 0x366   :  { %v4258_v30 = vpop.f32.mrb[40].mxu1 }
 0x367   :  { %v4260_v14 = vpop.f32.mrb[41].mxu1 }
 0x368   :  { %v4262_v34 = vpop.f32.mrb[42].mxu1 }
 0x369   :  { %v4264_v32 = vpop.f32.mrb[43].mxu1 }
 0x36e   :  { %v4266_v1 = vpop.f32.mrb[44].mxu1 }
 0x36f   :  { %v4268_v11 = vpop.f32.mrb[45].mxu1 }
 0x370   :  { %v4270_v13 = vpop.f32.mrb[46].mxu1 }
 0x371   :  { %v4272_v35 = vpop.f32.mrb[47].mxu1 }
 0x376   :  { %v1683_v15 = vpop.f32.mrb[48].mxu1 }
 0x377   :  { %v1808_v49 = vmax.f32 %v1613_v47, %v1683_v15  ;;  %v1685_v18 = vpop.f32.mrb[49].mxu1 }
 0x378   :  { %v1809_v17 = vmax.f32 %v1615_v52, %v1685_v18  ;;  %v1687_v50 = vpop.f32.mrb[50].mxu1 }
 0x379   :  { %v1810_v55 = vmax.f32 %v1617_v7, %v1687_v50  ;;  %v1689_v36 = vpop.f32.mrb[51].mxu1 }
 0x37a   :  { %v1836_v37 = vmax.f32 %v1808_v49, %v1809_v17  ;;  %v1811_v38 = vmax.f32 %v1619_v16, %v1689_v36 }
 0x37c   :  { %v1857_v33 = vadd.f32 %v4277_v58, %v1836_v37  ;;  %v1837_v20 = vmax.f32 %v1810_v55, %v1811_v38 }
 0x37e   :  { %v1858_v57 = vadd.f32 %v4277_v58, %v1837_v20  ;;  %v1693_v60 = vpop.f32.mrb[52].mxu1  ;;  %v1871_v62 = vmax.f32 %v1857_v33, 0.0  ;;  %v3471_v33 = vld [vmem:[%s4547_s5 + $0x60] sm:$0xff]  }
 0x37f   :  { %v1812_v39 = vmax.f32 %v1623_v0, %v1693_v60  ;;  %v1695_v6 = vpop.f32.mrb[53].mxu1  ;;  %v3469_v0 = vld [vmem:[%s4547_s5 + $0x50] sm:$0xff]  }
 0x380   :  { %v1872_v59 = vmax.f32 %v1858_v57, 0.0  ;;  %v1813_v8 = vmax.f32 %v1625_v56, %v1695_v6  ;;  %v1697_v19 = vpop.f32.mrb[54].mxu1 }
 0x381   :  { %v1814_v44 = vmax.f32 %v1627_v51, %v1697_v19  ;;  %v1699_v23 = vpop.f32.mrb[55].mxu1 }
 0x382   :  { %v1885_v40 = vpack.c.bf16 %v1872_v59, %v1871_v62  ;;  %v1838_v24 = vmax.f32 %v1812_v39, %v1813_v8  ;;  %v1815_v3 = vmax.f32 %v1629_v21, %v1699_v23 }
 0x384   :  { %v1859_v45 = vadd.f32 %v4277_v58, %v1838_v24  ;;  %v1839_v22 = vmax.f32 %v1814_v44, %v1815_v3  ;;  %3065 = vmatmul.mubr.bf16.vlgmr.msra.gmra.mrb[92].mxu0 %v1885_v40  ;;  %v3473_v40 = vld [vmem:[%s4547_s5 + $0x70] sm:$0xff]  }
 0x385   :  { %3069 = vmatpush3.bf16.msra.mxu0 %v3467_v25  ;;  %3084 = vmatprep.mubr.msk.bf16.mxu0 %vm3525_vm2, %v3524_v5 }
 0x386   :  { %v1860_v10 = vadd.f32 %v4277_v58, %v1839_v22  ;;  %v1703_v26 = vpop.f32.mrb[56].mxu1  ;;  %3070 = vmatprep.subr.bf16.mxu0 %v3524_v5  ;;  %v1873_v4 = vmax.f32 %v1859_v45, 0.0 }
 0x387   :  { %v1816_v42 = vmax.f32 %v4234_v46, %v1703_v26  ;;  %v1705_v2 = vpop.f32.mrb[57].mxu1 }
 0x388   :  { %v1874_v48 = vmax.f32 %v1860_v10, 0.0  ;;  %v1817_v47 = vmax.f32 %v4236_v9, %v1705_v2  ;;  %v1707_v52 = vpop.f32.mrb[58].mxu1  ;;  %v3470_v9 = vld [vmem:[%s4547_s5 + $0x58] sm:$0xff]  }
 0x389   :  { %v1818_v7 = vmax.f32 %v4238_v61, %v1707_v52  ;;  %3071 = vmatpush3.bf16.msra.mxu0 %v3468_v41  ;;  %v1709_v16 = vpop.f32.mrb[59].mxu1  ;;  %v3475_v52 = vld [vmem:[%s4547_s5 + $0x80] sm:$0xff]  }
 0x38a   :  { %v4298_v56 = vpack.c.bf16 %v1874_v48, %v1873_v4  ;;  %v1840_v51 = vmax.f32 %v1816_v42, %v1817_v47  ;;  %v1819_v21 = vmax.f32 %v4240_v43, %v1709_v16  ;;  %3072 = vmatprep.subr.bf16.mxu0 %v3524_v5 }
 0x38c   :  { %v1861_v46 = vadd.f32 %v4277_v58, %v1840_v51  ;;  %v1841_v15 = vmax.f32 %v1818_v7, %v1819_v21 }
 0x38d   :  { %3073 = vmatpush3.bf16.msra.mxu0 %v3469_v0 }
 0x38e   :  { %v1862_v61 = vadd.f32 %v4277_v58, %v1841_v15  ;;  %v1713_v49 = vpop.f32.mrb[60].mxu1  ;;  %3074 = vmatprep.subr.bf16.mxu0 %v3524_v5  ;;  %v1875_v50 = vmax.f32 %v1861_v46, 0.0 }
 0x38f   :  { %v1820_v18 = vmax.f32 %v4242_v54, %v1713_v49  ;;  %v1715_v17 = vpop.f32.mrb[61].mxu1 }
 0x390   :  { %v1876_v43 = vmax.f32 %v1862_v61, 0.0  ;;  %v1821_v55 = vmax.f32 %v4244_v12, %v1715_v17  ;;  %v1717_v36 = vpop.f32.mrb[62].mxu1  ;;  %v3472_v12 = vld [vmem:[%s4547_s5 + $0x68] sm:$0xff]   ;;  %v3477_v17 = vld [vmem:[%s4547_s5 + $0x90] sm:$0xff]  }
 0x391   :  { %v1822_v37 = vmax.f32 %v4246_v28, %v1717_v36  ;;  %3075 = vmatpush3.bf16.msra.mxu0 %v3470_v9  ;;  %v1719_v38 = vpop.f32.mrb[63].mxu1 }
 0x392   :  { %v4314_v20 = vpack.c.bf16 %v1876_v43, %v1875_v50  ;;  %v1842_v57 = vmax.f32 %v1820_v18, %v1821_v55  ;;  %v1823_v60 = vmax.f32 %v4248_v63, %v1719_v38  ;;  %3076 = vmatprep.subr.bf16.mxu0 %v3524_v5 }
 0x394   :  { %v1863_v54 = vadd.f32 %v4277_v58, %v1842_v57  ;;  %v1843_v39 = vmax.f32 %v1822_v37, %v1823_v60  ;;  %v3480_v57 = vld [vmem:[%s4547_s5 + $0xa8] sm:$0xff]   ;;  %v3482_v60 = vld [vmem:[%s4547_s5 + $0xb8] sm:$0xff]  }
 0x395   :  { %3077 = vmatpush3.bf16.msra.mxu0 %v3471_v33 }
 0x396   :  { %v1864_v28 = vadd.f32 %v4277_v58, %v1843_v39  ;;  %v1723_v6 = vpop.f32.mrb[64].mxu1  ;;  %3078 = vmatprep.subr.bf16.mxu0 %v3524_v5  ;;  %v1877_v8 = vmax.f32 %v1863_v54, 0.0  ;;  %v3483_v54 = vld [vmem:[%s4547_s5 + $0xc0] sm:$0xff]   ;;  %v3484_v39 = vld [vmem:[%s4547_s5 + $0xc8] sm:$0xff]  }
 0x397   :  { %v1824_v62 = vmax.f32 %v4250_v27, %v1723_v6  ;;  %v1725_v59 = vpop.f32.mrb[65].mxu1  ;;  %v3488_v6 = vld [vmem:[%s4547_s5 + $0xe8] sm:$0xff]  }
 0x398   :  { %v1878_v63 = vmax.f32 %v1864_v28, 0.0  ;;  %v1825_v19 = vmax.f32 %v4252_v29, %v1725_v59  ;;  %v1727_v44 = vpop.f32.mrb[66].mxu1  ;;  %v3474_v29 = vld [vmem:[%s4547_s5 + $0x78] sm:$0xff]   ;;  %v3487_v28 = vld [vmem:[%s4547_s5 + $0xe0] sm:$0xff]  }
 0x399   :  { %v1826_v23 = vmax.f32 %v4254_v53, %v1727_v44  ;;  %3079 = vmatpush3.bf16.msra.mxu0 %v3472_v12  ;;  %v1729_v25 = vpop.f32.mrb[67].mxu1  ;;  %v3485_v12 = vld [vmem:[%s4547_s5 + $0xd0] sm:$0xff]   ;;  %v3490_v59 = vld [vmem:[%s4547_s5 + $0xf8] sm:$0xff]  }
 0x39a   :  { %v4330_v24 = vpack.c.bf16 %v1878_v63, %v1877_v8  ;;  %v1844_v3 = vmax.f32 %v1824_v62, %v1825_v19  ;;  %v1827_v45 = vmax.f32 %v4256_v31, %v1729_v25  ;;  %3080 = vmatprep.subr.bf16.mxu0 %v3524_v5  ;;  %v3489_v62 = vld [vmem:[%s4547_s5 + $0xf0] sm:$0xff]   ;;  %v3491_v8 = vld [vmem:[%s4547_s5 + $0x100] sm:$0xff]   ;;  %v3492_v63 = vld [vmem:[%s4547_s5 + $0x108] sm:$0xff]  }
 0x39b   :  { %v3493_v19 = vld [vmem:[%s4547_s5 + $0x110] sm:$0xff]   ;;  %v3494_v44 = vld [vmem:[%s4547_s5 + $0x118] sm:$0xff]   ;;  %v3496_v25 = vld [vmem:[%s4547_s5 + $0x128] sm:$0xff]  }
 0x39c   :  { %v1865_v27 = vadd.f32 %v4277_v58, %v1844_v3  ;;  %v1845_v22 = vmax.f32 %v1826_v23, %v1827_v45  ;;  %v3495_v23 = vld [vmem:[%s4547_s5 + $0x120] sm:$0xff]   ;;  %v3500_v45 = vld [vmem:[%s4547_s5 + $0x148] sm:$0xff]  }
 0x39d   :  { %3081 = vmatpush3.bf16.msra.mxu0 %v3473_v40  ;;  %v3497_v40 = vld [vmem:[%s4547_s5 + $0x130] sm:$0xff]   ;;  %v3499_v3 = vld [vmem:[%s4547_s5 + $0x140] sm:$0xff]  }
 0x39e   :  { %v1866_v53 = vadd.f32 %v4277_v58, %v1845_v22  ;;  %v1733_v41 = vpop.f32.mrb[68].mxu1  ;;  %3082 = vmatprep.subr.bf16.mxu0 %v3524_v5  ;;  %v1879_v42 = vmax.f32 %v1865_v27, 0.0  ;;  %v3501_v27 = vld [vmem:[%s4547_s5 + $0x150] sm:$0xff]   ;;  %v3502_v22 = vld [vmem:[%s4547_s5 + $0x158] sm:$0xff]  }
 0x39f   :  { %v1828_v10 = vmax.f32 %v4258_v30, %v1733_v41  ;;  %v1735_v26 = vpop.f32.mrb[69].mxu1  ;;  %v3505_v41 = vld [vmem:[%s4547_s5 + $0x170] sm:$0xff]  }
 0x3a0   :  { %v1880_v31 = vmax.f32 %v1866_v53, 0.0  ;;  %v1829_v2 = vmax.f32 %v4260_v14, %v1735_v26  ;;  %v1737_v4 = vpop.f32.mrb[70].mxu1  ;;  %v3476_v14 = vld [vmem:[%s4547_s5 + $0x88] sm:$0xff]   ;;  %v3507_v26 = vld [vmem:[%s4547_s5 + $0x180] sm:$0xff]  }
 0x3a1   :  { %v1830_v48 = vmax.f32 %v4262_v34, %v1737_v4  ;;  %3083 = vmatpush3.bf16.msra.mxu0 %v3474_v29  ;;  %v1739_v47 = vpop.f32.mrb[71].mxu1  ;;  %v3503_v29 = vld [vmem:[%s4547_s5 + $0x160] sm:$0xff]   ;;  %v3504_v53 = vld [vmem:[%s4547_s5 + $0x168] sm:$0xff]  }
 0x3a2   :  { %v4346_v7 = vpack.c.bf16 %v1880_v31, %v1879_v42  ;;  %v1846_v16 = vmax.f32 %v1828_v10, %v1829_v2  ;;  %v1831_v0 = vmax.f32 %v4264_v32, %v1739_v47  ;;  %3088 = vmatprep.subr.bf16.mxu0 %v3524_v5  ;;  %v3506_v10 = vld [vmem:[%s4547_s5 + $0x178] sm:$0xff]   ;;  %v3508_v42 = vld [vmem:[%s4547_s5 + $0x188] sm:$0xff]   ;;  %v3509_v31 = vld [vmem:[%s4547_s5 + $0x190] sm:$0xff]  }
 0x3a3   :  { %v3510_v2 = vld [vmem:[%s4547_s5 + $0x198] sm:$0xff]   ;;  %v3511_v4 = vld [vmem:[%s4547_s5 + $0x1a0] sm:$0xff]   ;;  %v3513_v47 = vld [vmem:[%s4547_s5 + $0x1b0] sm:$0xff]  }
 0x3a4   :  { %v1867_v30 = vadd.f32 %v4277_v58, %v1846_v16  ;;  %v1847_v51 = vmax.f32 %v1830_v48, %v1831_v0  ;;  %3085 = vmatmul.mubr.bf16.vlgmr.msra.gmra.mrb[92].mxu0 %v4298_v56  ;;  %v3512_v48 = vld [vmem:[%s4547_s5 + $0x1a8] sm:$0xff]  }
 0x3a5   :  { %3089 = vmatpush3.bf16.msra.mxu0 %v3475_v52  ;;  %3104 = vmatprep.mubr.msk.bf16.mxu0 %vm3525_vm2, %v3524_v5  ;;  %v3514_v52 = vld [vmem:[%s4547_s5 + $0x1b8] sm:$0xff]  }
 0x3a6   :  { %v1868_v34 = vadd.f32 %v4277_v58, %v1847_v51  ;;  %v1743_v21 = vpop.f32.mrb[72].mxu1  ;;  %3090 = vmatprep.subr.bf16.mxu0 %v3524_v5  ;;  %v1881_v15 = vmax.f32 %v1867_v30, 0.0 }
 0x3a7   :  { %v1832_v32 = vmax.f32 %v4266_v1, %v1743_v21  ;;  %v1745_v46 = vpop.f32.mrb[73].mxu1 }
 0x3a8   :  { %v1882_v9 = vmax.f32 %v1868_v34, 0.0  ;;  %v1833_v56 = vmax.f32 %v4268_v11, %v1745_v46  ;;  %v1747_v61 = vpop.f32.mrb[74].mxu1  ;;  %v3478_v11 = vld [vmem:[%s4547_s5 + $0x98] sm:$0xff]  }
 0x3a9   :  { %v1834_v49 = vmax.f32 %v4270_v13, %v1747_v61  ;;  %3091 = vmatpush3.bf16.msra.mxu0 %v3476_v14  ;;  %v1749_v18 = vpop.f32.mrb[75].mxu1 }
 0x3aa   :  { %v4365_v50 = vpack.c.bf16 %v1882_v9, %v1881_v15  ;;  %v1848_v43 = vmax.f32 %v1832_v32, %v1833_v56  ;;  %v1835_v55 = vmax.f32 %v4272_v35, %v1749_v18  ;;  %3092 = vmatprep.subr.bf16.mxu0 %v3524_v5  ;;  %v3479_v35 = vld [vmem:[%s4547_s5 + $0xa0] sm:$0xff]  }
 0x3ac   :  { %v1869_v1 = vadd.f32 %v4277_v58, %v1848_v43  ;;  %v1849_v36 = vmax.f32 %v1834_v49, %v1835_v55 }
 0x3ad   :  { %3093 = vmatpush3.bf16.msra.mxu0 %v3477_v17 }
 0x3ae   :  { %v1870_v13 = vadd.f32 %v4277_v58, %v1849_v36  ;;  %3094 = vmatprep.subr.bf16.mxu0 %v3524_v5  ;;  %v1883_v37 = vmax.f32 %v1869_v1, 0.0  ;;  %v3481_v58 = vld [vmem:[%s4547_s5 + $0xb0] sm:$0xff]  }
 0x3b0   :  { %v1884_v38 = vmax.f32 %v1870_v13, 0.0 }
 0x3b1   :  { %3095 = vmatpush3.bf16.msra.mxu0 %v3478_v11 }
 0x3b2   :  { %v4378_v33 = vpack.c.bf16 %v1884_v38, %v1883_v37  ;;  %3096 = vmatprep.subr.bf16.mxu0 %v3524_v5 }
 0x3b5   :  { %3097 = vmatpush3.bf16.msra.mxu0 %v3479_v35 }
 0x3b6   :  { %3098 = vmatprep.subr.bf16.mxu0 %v3524_v5 }
 0x3b9   :  { %3099 = vmatpush3.bf16.msra.mxu0 %v3480_v57 }
 0x3ba   :  { %3100 = vmatprep.subr.bf16.mxu0 %v3524_v5 }
 0x3bd   :  { %3101 = vmatpush3.bf16.msra.mxu0 %v3481_v58 }
 0x3be   :  { %3102 = vmatprep.subr.bf16.mxu0 %v3524_v5 }
 0x3c1   :  { %3103 = vmatpush3.bf16.msra.mxu0 %v3482_v60 }
 0x3c2   :  { %3108 = vmatprep.subr.bf16.mxu0 %v3524_v5 }
 0x3c4   :  { %3105 = vmatmul.mubr.bf16.vlgmr.msra.gmra.mrb[92].mxu0 %v4314_v20  ;;  %v3486_v20 = vld [vmem:[%s4547_s5 + $0xd8] sm:$0xff]  }
 0x3c5   :  { %3109 = vmatpush3.bf16.msra.mxu0 %v3483_v54  ;;  %3124 = vmatprep.mubr.msk.bf16.mxu0 %vm3525_vm2, %v3524_v5 }
 0x3c6   :  { %3110 = vmatprep.subr.bf16.mxu0 %v3524_v5 }
 0x3c9   :  { %3111 = vmatpush3.bf16.msra.mxu0 %v3484_v39 }
 0x3ca   :  { %3112 = vmatprep.subr.bf16.mxu0 %v3524_v5 }
 0x3cd   :  { %3113 = vmatpush3.bf16.msra.mxu0 %v3485_v12 }
 0x3ce   :  { %3114 = vmatprep.subr.bf16.mxu0 %v3524_v5 }
 0x3d1   :  { %3115 = vmatpush3.bf16.msra.mxu0 %v3486_v20 }
 0x3d2   :  { %3116 = vmatprep.subr.bf16.mxu0 %v3524_v5 }
 0x3d5   :  { %3117 = vmatpush3.bf16.msra.mxu0 %v3487_v28 }
 0x3d6   :  { %3118 = vmatprep.subr.bf16.mxu0 %v3524_v5 }
 0x3d9   :  { %3119 = vmatpush3.bf16.msra.mxu0 %v3488_v6 }
 0x3da   :  { %3120 = vmatprep.subr.bf16.mxu0 %v3524_v5 }
 0x3dd   :  { %3121 = vmatpush3.bf16.msra.mxu0 %v3489_v62 }
 0x3de   :  { %3122 = vmatprep.subr.bf16.mxu0 %v3524_v5 }
 0x3e1   :  { %3123 = vmatpush3.bf16.msra.mxu0 %v3490_v59 }
 0x3e2   :  { %3128 = vmatprep.subr.bf16.mxu0 %v3524_v5 }
 0x3e4   :  { %3125 = vmatmul.mubr.bf16.vlgmr.msra.gmra.mrb[92].mxu0 %v4330_v24  ;;  %v3498_v24 = vld [vmem:[%s4547_s5 + $0x138] sm:$0xff]  }
 0x3e5   :  { %3129 = vmatpush3.bf16.msra.mxu0 %v3491_v8  ;;  %3144 = vmatprep.mubr.msk.bf16.mxu0 %vm3525_vm2, %v3524_v5 }
 0x3e6   :  { %3130 = vmatprep.subr.bf16.mxu0 %v3524_v5 }
 0x3e9   :  { %3131 = vmatpush3.bf16.msra.mxu0 %v3492_v63 }
 0x3ea   :  { %3132 = vmatprep.subr.bf16.mxu0 %v3524_v5 }
 0x3ed   :  { %3133 = vmatpush3.bf16.msra.mxu0 %v3493_v19 }
 0x3ee   :  { %3134 = vmatprep.subr.bf16.mxu0 %v3524_v5 }
 0x3f1   :  { %3135 = vmatpush3.bf16.msra.mxu0 %v3494_v44 }
 0x3f2   :  { %3136 = vmatprep.subr.bf16.mxu0 %v3524_v5 }
 0x3f5   :  { %3137 = vmatpush3.bf16.msra.mxu0 %v3495_v23 }
 0x3f6   :  { %3138 = vmatprep.subr.bf16.mxu0 %v3524_v5 }
 0x3f9   :  { %3139 = vmatpush3.bf16.msra.mxu0 %v3496_v25 }
 0x3fa   :  { %3140 = vmatprep.subr.bf16.mxu0 %v3524_v5 }
 0x3fd   :  { %3141 = vmatpush3.bf16.msra.mxu0 %v3497_v40 }
 0x3fe   :  { %3142 = vmatprep.subr.bf16.mxu0 %v3524_v5 }
 0x401   :  { %3143 = vmatpush3.bf16.msra.mxu0 %v3498_v24 }
 0x402   :  { %3148 = vmatprep.subr.bf16.mxu0 %v3524_v5 }
 0x404   :  { %3145 = vmatmul.mubr.bf16.vlgmr.msra.gmra.mrb[92].mxu0 %v4346_v7  ;;  %v2832_v7 = vld [vmem:[%s4549_s6] ss:$0 sm:$0xff] }
 0x405   :  { %3149 = vmatpush3.bf16.msra.mxu0 %v3499_v3  ;;  %3164 = vmatprep.mubr.msk.bf16.mxu0 %vm3525_vm2, %v3524_v5 }
 0x406   :  { %3150 = vmatprep.subr.bf16.mxu0 %v3524_v5 }
 0x409   :  { %3151 = vmatpush3.bf16.msra.mxu0 %v3500_v45 }
 0x40a   :  { %3152 = vmatprep.subr.bf16.mxu0 %v3524_v5 }
 0x40d   :  { %3153 = vmatpush3.bf16.msra.mxu0 %v3501_v27 }
 0x40e   :  { %3154 = vmatprep.subr.bf16.mxu0 %v3524_v5 }
 0x411   :  { %3155 = vmatpush3.bf16.msra.mxu0 %v3502_v22 }
 0x412   :  { %3156 = vmatprep.subr.bf16.mxu0 %v3524_v5 }
 0x415   :  { %3157 = vmatpush3.bf16.msra.mxu0 %v3503_v29 }
 0x416   :  { %3158 = vmatprep.subr.bf16.mxu0 %v3524_v5 }
 0x419   :  { %3159 = vmatpush3.bf16.msra.mxu0 %v3504_v53 }
 0x41a   :  { %3160 = vmatprep.subr.bf16.mxu0 %v3524_v5 }
 0x41d   :  { %3161 = vmatpush3.bf16.msra.mxu0 %v3505_v41 }
 0x41e   :  { %3162 = vmatprep.subr.bf16.mxu0 %v3524_v5 }
 0x421   :  { %3163 = vmatpush3.bf16.msra.mxu0 %v3506_v10 }
 0x422   :  { %3168 = vmatprep.subr.bf16.mxu0 %v3524_v5 }
 0x424   :  { %3165 = vmatmul.mubr.bf16.vlgmr.msra.gmra.mrb[92].mxu0 %v4365_v50 }
 0x425   :  { %3169 = vmatpush3.bf16.msra.mxu0 %v3507_v26  ;;  %3184 = vmatprep.mubr.msk.bf16.mxu0 %vm3525_vm2, %v3524_v5 }
 0x426   :  { %3170 = vmatprep.subr.bf16.mxu0 %v3524_v5 }
 0x429   :  { %3171 = vmatpush3.bf16.msra.mxu0 %v3508_v42 }
 0x42a   :  { %3172 = vmatprep.subr.bf16.mxu0 %v3524_v5 }
 0x42d   :  { %3173 = vmatpush3.bf16.msra.mxu0 %v3509_v31 }
 0x42e   :  { %3174 = vmatprep.subr.bf16.mxu0 %v3524_v5 }
 0x431   :  { %3175 = vmatpush3.bf16.msra.mxu0 %v3510_v2 }
 0x432   :  { %3176 = vmatprep.subr.bf16.mxu0 %v3524_v5 }
 0x435   :  { %3177 = vmatpush3.bf16.msra.mxu0 %v3511_v4 }
 0x436   :  { %3178 = vmatprep.subr.bf16.mxu0 %v3524_v5 }
 0x439   :  { %3179 = vmatpush3.bf16.msra.mxu0 %v3512_v48 }
 0x43a   :  { %3180 = vmatprep.subr.bf16.mxu0 %v3524_v5 }
 0x43d   :  { %3181 = vmatpush3.bf16.msra.mxu0 %v3513_v47 }
 0x43e   :  { %3182 = vmatprep.subr.bf16.mxu0 %v3524_v5 }
 0x441   :  { %3183 = vmatpush3.bf16.msra.mxu0 %v3514_v52 }
 0x444   :  { %3185 = vmatmul.mubr.bf16.vlgmr.msra.gmra.mrb[92].mxu0 %v4378_v33 }
 0x517   :  { %v2646_v16 = vpop.f32.mrb[92].mxu0 }
 0x518   :  { %v3200_v0 = vadd.f32 %v2832_v7, %v2646_v16  ;;  %v3186_v30 = vpop.f32.mrb[93].mxu0 }
 0x519   :  { %v2649_v51 = vpop.f32.mrb[94].mxu0 }
 0x51a   :  { %2655 = vmax.xlane.f32.xlu0 %v3200_v0  ;;  %v3187_v14 = vpop.f32.mrb[95].mxu0  ;;  %v3201_v34 = vadd.f32 %v2832_v7, %v2649_v51 }
 0x51e   :  { %2657 = vmax.xlane.f32.xlu0 %v3201_v34 }
 0x5a7   :  { %v2656_v21 = vpop.xlane.xlu0 %2655 }
 0x5a8   :  { %v2659_v32 = vsub.f32 %v3200_v0, %v2656_v21 }
 0x5aa   :  { %v2661_v46 = vmul.f32 1.442695, %v2659_v32 }
 0x5ab   :  { %v2658_v15 = vpop.xlane.xlu0 %2657 }
 0x5ac   :  { %v2660_v5 = vsub.f32 %v3201_v34, %v2658_v15  ;;  %3515 = vpow2.f32 %v2661_v46 }
 0x5ae   :  { %v2663_v9 = vmul.f32 1.442695, %v2660_v5 }
 0x5b0   :  { %3517 = vpow2.f32 %v2663_v9 }
 0x5b6   :  { %v3516_v56 = vpop.eup %3515 }
 0x5b7   :  { %2665 = vadd.xlane.f32.xlu1 %v3516_v56 }
 0x5ba   :  { %v3518_v61 = vpop.eup %3517 }
 0x5bb   :  { %2667 = vadd.xlane.f32.xlu1 %v3518_v61 }
 0x644   :  { %v2666_v49 = vpop.xlane.xlu1 %2665 }
 0x645   :  { %3519 = vlog2.f32 %v2666_v49 }
 0x648   :  { %v2668_v18 = vpop.xlane.xlu1 %2667 }
 0x649   :  { %3521 = vlog2.f32 %v2668_v18 }
 0x64f   :  { %v3520_v17 = vpop.eup %3519 }
 0x650   :  { %v2670_v50 = vmul.f32 0.6931472, %v3520_v17 }
 0x652   :  { %v2673_v43 = vsub.f32 %v2659_v32, %v2670_v50 }
 0x653   :  { %v3522_v55 = vpop.eup %3521 }
 0x654   :  { %2675 = vst [vmem:[%s4550_s7] sm:$0xff] %v2673_v43  ;;  %v2672_v1 = vmul.f32 0.6931472, %v3522_v55 }
 0x656   :  { %v2674_v36 = vsub.f32 %v2660_v5, %v2672_v1 }
 0x658   :  { %2676 = vst [vmem:[%s4550_s7 + $0x8] sm:$0xff] %v2674_v36 }

</bundles_post_ra>
